<compile_context>
chip_gen: v6e
topology: v6e:2x2x1
jax: 0.10.0
libtpu: 0.0.40
codegen_flags: <defaults>
</compile_context>

<pallas_src>
import jax
import jax.numpy as jnp
from jax.experimental import pallas as pl
from jax.experimental.pallas import tpu as pltpu

LANE = 128
VMEM_LIMIT_BYTES = 32 << 20        # explicit scoped-VMEM limit passed to every pallas_call
VMEM_BUFFER_BUDGET = 16 << 20      # budget for double-buffered tiles + kernel temporaries

C1_K = 5 * 5 * 3                   # conv1 im2col contraction = 75
C1_KPAD = 128
C1_OUT_PAD = 8                     # conv1 output channels kept (6 real + 2 exact zeros)
C2_K = 5 * 5 * C1_OUT_PAD          # conv2 im2col contraction = 200
C2_KPAD = 256
C2_OUT = 16
FC1_K = 5 * 5 * C2_OUT             # fc1 contraction = 400
FC1_KPAD = 512
FC_TM_MAX = 512                    # fc row-tile cap


def _round_up(x, m):
    return ((x + m - 1) // m) * m


# ----------------------------- Pallas kernels ------------------------------

def _conv_relu_pool_kernel(x_ref, w_ref, b_ref, o_ref):
    """o = relu(max over the 4 pool-window corners of (x_corner @ w) + b).

    x: (4, tm, K) stacked corner patches, w: (K, 128), b: (1, 128), o: (tm, 128).
    One long (4*tm, K) @ (K, 128) matmul keeps the MXU fed; ReLU/bias applied once after the
    corner max (exactly equivalent to max-of-relu since ReLU is monotone and bias is shared).
    """
    c, tm, k = x_ref.shape
    x2d = x_ref[...].reshape(c * tm, k)
    acc = jnp.dot(x2d, w_ref[...], preferred_element_type=jnp.float32)   # (4*tm, 128)
    m = jnp.max(acc.reshape(c, tm, -1), axis=0)                          # (tm, 128)
    o_ref[...] = jnp.maximum(m + b_ref[...], 0.0)


def _fc_fused_kernel(x_ref, w1_ref, b1_ref, w2_ref, b2_ref, w3_ref, b3_ref, o_ref):
    """Fused fc1 -> relu -> fc2 -> relu -> fc3; intermediates never leave VMEM."""
    h = jnp.dot(x_ref[...], w1_ref[...], preferred_element_type=jnp.float32) + b1_ref[...]
    h = jnp.maximum(h, 0.0)
    h = jnp.dot(h, w2_ref[...], preferred_element_type=jnp.float32) + b2_ref[...]
    h = jnp.maximum(h, 0.0)
    o_ref[...] = jnp.dot(h, w3_ref[...], preferred_element_type=jnp.float32) + b3_ref[...]


# ----------------------------- kernel wrappers ------------------------------

def _pick_row_tile(M, K, N, *, min_steps=2, vmem_budget=VMEM_BUFFER_BUDGET):
    """Largest row tile whose full VMEM footprint fits the budget, while still giving at least
    `min_steps` grid steps (so both v7x TensorCores get work)."""
    fixed = 2 * (K * N + N) * 4                 # double-buffered weight + bias (const index)
    per_row = (2 * 4 * K                        # double-buffered stacked (4, tm, K) input
               + 2 * N                          # double-buffered (tm, N) output
               + 4 * N                          # (4, tm, N) f32 accumulator temp
               + 4 * K) * 4                     # headroom for a reshape copy of the input tile
    cap = max(8, ((vmem_budget - fixed) // per_row) // 8 * 8)
    tm = _round_up(pl.cdiv(M, min_steps), 8)
    tm = max(8, min(tm, cap))
    grid = pl.cdiv(M, tm)
    return tm, grid


def conv_relu_pool(corners, w_mat, bias):
    """corners: (4, M, K) stacked im2col patches (one slab per 2x2 pool-window corner).
    Returns (M, 128) = maxpool2x2(relu(conv(x))) with the channel dim zero-padded to 128."""
    _, M, K = corners.shape
    N = w_mat.shape[1]
    tm, grid = _pick_row_tile(M, K, N)
    Mp = tm * grid
    padded = jnp.pad(corners, ((0, 0), (0, Mp - M), (0, 0)))
    out = pl.pallas_call(
        _conv_relu_pool_kernel,
        out_shape=jax.ShapeDtypeStruct((Mp, N), jnp.float32),
        grid=(grid,),
        in_specs=[pl.BlockSpec((4, tm, K), lambda i: (0, i, 0)),
                  pl.BlockSpec((K, N), lambda i: (0, 0)),
                  pl.BlockSpec((1, N), lambda i: (0, 0))],
        out_specs=pl.BlockSpec((tm, N), lambda i: (i, 0)),
        compiler_params=pltpu.CompilerParams(
            dimension_semantics=("parallel",),
            vmem_limit_bytes=VMEM_LIMIT_BYTES),
    )(padded, w_mat, bias)
    return out[:M]


def fc_fused(x, w1, b1, w2, b2, w3, b3, *, n_classes):
    """logits = fc3(relu(fc2(relu(fc1(x))))) in one row-tiled pallas_call (lane-padded to 128).
    Weight/bias block indices are constant so they stay VMEM-resident across the grid."""
    M, K = x.shape
    tm = max(8, min(FC_TM_MAX, _round_up(pl.cdiv(M, 2), 8)))
    grid = pl.cdiv(M, tm)
    Mp = tm * grid
    xp = jnp.pad(x, ((0, Mp - M), (0, 0)))
    const = lambda i: (0, 0)
    out = pl.pallas_call(
        _fc_fused_kernel,
        out_shape=jax.ShapeDtypeStruct((Mp, LANE), jnp.float32),
        grid=(grid,),
        in_specs=[pl.BlockSpec((tm, K), lambda i: (i, 0)),
                  pl.BlockSpec((K, LANE), const), pl.BlockSpec((1, LANE), const),
                  pl.BlockSpec((LANE, LANE), const), pl.BlockSpec((1, LANE), const),
                  pl.BlockSpec((LANE, LANE), const), pl.BlockSpec((1, LANE), const)],
        out_specs=pl.BlockSpec((tm, LANE), lambda i: (i, 0)),
        compiler_params=pltpu.CompilerParams(
            dimension_semantics=("parallel",),
            vmem_limit_bytes=VMEM_LIMIT_BYTES),
    )(xp, w1, b1, w2, b2, w3, b3)
    return out[:M, :n_classes]


# ------------------------------- JAX glue -----------------------------------

def im2col_pool_corners(x_nhwc, k, k_pad):
    """Valid k x k patches (feature order (kh, kw, cin)) for the 4 corners of each 2x2 pooling
    window, built directly from strided slices (no full patches tensor is materialized).
    Returns ((4, B*PH*PW, k_pad), (PH, PW))."""
    B, H, W, C = x_nhwc.shape
    OH, OW = H - k + 1, W - k + 1
    PH, PW = OH // 2, OW // 2
    K = k * k * C
    corners = []
    for di in range(2):
        for dj in range(2):
            cols = [x_nhwc[:, di + kh: di + kh + 2 * PH: 2,
                           dj + kw: dj + kw + 2 * PW: 2, :]
                    for kh in range(k) for kw in range(k)]
            corners.append(jnp.concatenate(cols, axis=-1).reshape(B * PH * PW, K))
    stacked = jnp.stack(corners, axis=0)                                 # (4, M, K)
    if k_pad > K:
        stacked = jnp.pad(stacked, ((0, 0), (0, 0), (0, k_pad - K)))
    return stacked, (PH, PW)


def _pad_to(x, shape):
    return jnp.pad(x, [(0, t - s) for s, t in zip(x.shape, shape)])


def prepare_params(p):
    """One-time transform of torch-layout params into lane-dense matmul operands matching the
    im2col feature order and the tightly-padded channel dims used by the kernels."""
    # conv1: (6,3,5,5) -> rows (kh,kw,cin)=75 -> (128, 128)
    w1 = jnp.transpose(p["conv1_w"], (2, 3, 1, 0)).reshape(C1_K, 6)
    w1 = _pad_to(w1, (C1_KPAD, LANE))
    # conv2: (16,6,5,5) -> rows (kh,kw,cin_pad8)=200 -> (256, 128); cin rows 6,7 are zero
    w2 = _pad_to(jnp.transpose(p["conv2_w"], (2, 3, 1, 0)), (5, 5, C1_OUT_PAD, LANE))
    w2 = _pad_to(w2.reshape(C2_K, LANE), (C2_KPAD, LANE))
    # fc1: (120, 400) over torch's (c,h,w) flatten -> rows permuted to our (h, w, c=16) flatten
    f1 = jnp.transpose(p["fc1_w"].reshape(120, C2_OUT, 5, 5), (2, 3, 1, 0))   # (5,5,16,120)
    f1 = _pad_to(f1.reshape(FC1_K, 120), (FC1_KPAD, LANE))
    f2 = _pad_to(p["fc2_w"].T, (LANE, LANE))
    f3 = _pad_to(p["fc3_w"].T, (LANE, LANE))

    def pad_bias(b):
        return _pad_to(b, (LANE,)).reshape(1, LANE).astype(jnp.float32)

    return {
        "conv1_w": w1.astype(jnp.float32), "conv1_b": pad_bias(p["conv1_b"]),
        "conv2_w": w2.astype(jnp.float32), "conv2_b": pad_bias(p["conv2_b"]),
        "fc1_w": f1.astype(jnp.float32), "fc1_b": pad_bias(p["fc1_b"]),
        "fc2_w": f2.astype(jnp.float32), "fc2_b": pad_bias(p["fc2_b"]),
        "fc3_w": f3.astype(jnp.float32), "fc3_b": pad_bias(p["fc3_b"]),
    }


def init_params(key):
    """Deterministic synthetic init (PyTorch-style uniform +/-1/sqrt(fan_in)), torch layouts."""
    def uinit(k, shape, fan_in):
        bound = 1.0 / float(fan_in) ** 0.5
        return jax.random.uniform(k, shape, jnp.float32, -bound, bound)

    ks = jax.random.split(key, 10)
    return {
        "conv1_w": uinit(ks[0], (6, 3, 5, 5), 3 * 5 * 5),
        "conv1_b": uinit(ks[1], (6,), 3 * 5 * 5),
        "conv2_w": uinit(ks[2], (16, 6, 5, 5), 6 * 5 * 5),
        "conv2_b": uinit(ks[3], (16,), 6 * 5 * 5),
        "fc1_w": uinit(ks[4], (120, 400), 400),
        "fc1_b": uinit(ks[5], (120,), 400),
        "fc2_w": uinit(ks[6], (84, 120), 120),
        "fc2_b": uinit(ks[7], (84,), 120),
        "fc3_w": uinit(ks[8], (10, 84), 84),
        "fc3_b": uinit(ks[9], (10,), 84),
    }


@jax.jit
def net_forward(prep, x_nchw):
    """Forward pass of Net; x_nchw: (B, 3, 32, 32) float32 -> (B, 10) logits."""
    B = x_nchw.shape[0]
    x = jnp.transpose(x_nchw, (0, 2, 3, 1)).astype(jnp.float32)             # NCHW -> NHWC

    # conv1 (3->6, k=5) + ReLU + 2x2 pool, fused.  Lane-dense 128-wide store; only the first
    # 8 channels (6 real + 2 exact zeros) are kept for the next layer.
    c1, (ph1, pw1) = im2col_pool_corners(x, 5, C1_KPAD)                      # K: 75 -> 128
    y1 = conv_relu_pool(c1, prep["conv1_w"], prep["conv1_b"])                # (B*14*14, 128)
    y1 = y1[:, :C1_OUT_PAD].reshape(B, ph1, pw1, C1_OUT_PAD)                 # (B,14,14,8)

    # conv2 (6->16, k=5) + ReLU + 2x2 pool, fused; contraction dim 200 -> padded to 256
    c2, (ph2, pw2) = im2col_pool_corners(y1, 5, C2_KPAD)
    y2 = conv_relu_pool(c2, prep["conv2_w"], prep["conv2_b"])                # (B*5*5, 128)

    # flatten in (h, w, c=16) order; fc1 weight rows were permuted to match torch's
    # x.view(-1, 16*5*5) (c, h, w) order.  Contraction dim 400 -> padded to 512.
    flat = y2[:, :C2_OUT].reshape(B, ph2 * pw2 * C2_OUT)                     # (B, 400)
    flat = jnp.pad(flat, ((0, 0), (0, FC1_KPAD - flat.shape[1])))            # (B, 512)
    return fc_fused(flat, prep["fc1_w"], prep["fc1_b"],
                    prep["fc2_w"], prep["fc2_b"],
                    prep["fc3_w"], prep["fc3_b"], n_classes=10)


# TODO(synk): only the forward pass is implemented; the SGD training loop / CrossEntropyLoss /
# data loading in the original script are host-side training driver code, not kernel material.

if __name__ == "__main__":
    key = jax.random.PRNGKey(0)
    k_param, k_data = jax.random.split(key)
    params = init_params(k_param)
    prep = prepare_params(params)
    x = jax.random.normal(k_data, (2, 3, 32, 32), dtype=jnp.float32)         # CIFAR-sized input
    logits = net_forward(prep, x)
    logits = jax.block_until_ready(logits)
    assert logits.shape == (2, 10) and logits.dtype == jnp.float32
    assert bool(jnp.all(jnp.isfinite(logits)))
    print("KERNEL_OK")
</pallas_src>

<mosaic_0001>
module attributes {stable_mosaic.version = 11 : i64} {
  func.func @_conv_relu_pool_kernel(%arg0: i32, %arg1: memref<4x200x128xf32, #tpu.memory_space<vmem>>, %arg2: memref<128x128xf32, #tpu.memory_space<vmem>>, %arg3: memref<1x128xf32, #tpu.memory_space<vmem>>, %arg4: memref<200x128xf32, #tpu.memory_space<vmem>>) attributes {dimension_semantics = [#tpu.dimension_semantics<parallel>], iteration_bounds = array<i64: 2>, scalar_prefetch = 0 : i64, scratch_operands = 0 : i64, tpu.core_type = #tpu.core_type<tc>, window_params = [{transform_indices = @transform_0, window_bounds = array<i64: 4, 200, 128>}, {pipeline_mode = #tpu.pipeline_mode<synchronous>, transform_indices = @transform_1, window_bounds = array<i64: 128, 128>}, {pipeline_mode = #tpu.pipeline_mode<synchronous>, transform_indices = @transform_2, window_bounds = array<i64: 1, 128>}, {transform_indices = @transform_3, window_bounds = array<i64: 200, 128>}]} {
    %c0 = arith.constant 0 : index
    %c0_0 = arith.constant 0 : index
    %c0_1 = arith.constant 0 : index
    %0 = vector.load %arg1[%c0, %c0_0, %c0_1] : memref<4x200x128xf32, #tpu.memory_space<vmem>>, vector<4x200x128xf32>
    %1 = vector.shape_cast %0 : vector<4x200x128xf32> to vector<800x128xf32>
    %c0_2 = arith.constant 0 : index
    %c0_3 = arith.constant 0 : index
    %2 = vector.load %arg2[%c0_2, %c0_3] : memref<128x128xf32, #tpu.memory_space<vmem>>, vector<128x128xf32>
    %cst = arith.constant dense<0.000000e+00> : vector<800x128xf32>
    %3 = tpu.matmul %1, %2, %cst {dimension_numbers = #tpu.dot_dimension_numbers<[1], [0], [0], [1], [0, 0, 1, 1], [], []>} : vector<800x128xf32>, vector<128x128xf32>, vector<800x128xf32> -> vector<800x128xf32>
    %4 = vector.shape_cast %3 : vector<800x128xf32> to vector<4x200x128xf32>
    %cst_4 = arith.constant dense<0xFF800000> : vector<200x128xf32>
    %5 = vector.multi_reduction <maximumf>, %4, %cst_4 [0] : vector<4x200x128xf32> to vector<200x128xf32>
    %c0_5 = arith.constant 0 : index
    %c0_6 = arith.constant 0 : index
    %6 = vector.load %arg3[%c0_5, %c0_6] : memref<1x128xf32, #tpu.memory_space<vmem>>, vector<1x128xf32>
    %7 = vector.broadcast %6 : vector<1x128xf32> to vector<200x128xf32>
    %8 = arith.addf %5, %7 : vector<200x128xf32>
    %cst_7 = arith.constant 0.000000e+00 : f32
    %9 = vector.broadcast %cst_7 : f32 to vector<200x128xf32>
    %10 = arith.maximumf %8, %9 : vector<200x128xf32>
    %c0_8 = arith.constant 0 : index
    %c0_9 = arith.constant 0 : index
    %11 = vector.load %arg4[%c0_8, %c0_9] : memref<200x128xf32, #tpu.memory_space<vmem>>, vector<200x128xf32>
    tpu.vector_store %arg4[%c0_8, %c0_9], %10 {strides = array<i32>} : memref<200x128xf32, #tpu.memory_space<vmem>>, vector<200x128xf32>,
    return
  }
  func.func @transform_0(%arg0: i32) -> (i32, i32, i32) {
    %c0_i32 = arith.constant 0 : i32
    %c0_i32_0 = arith.constant 0 : i32
    %c0_i32_1 = arith.constant 0 : i32
    return %c0_i32, %arg0, %c0_i32_0 : i32, i32, i32
  }
  func.func @transform_1(%arg0: i32) -> (i32, i32) {
    %c0_i32 = arith.constant 0 : i32
    %c0_i32_0 = arith.constant 0 : i32
    %c0_i32_1 = arith.constant 0 : i32
    return %c0_i32, %c0_i32_0 : i32, i32
  }
  func.func @transform_2(%arg0: i32) -> (i32, i32) {
    %c0_i32 = arith.constant 0 : i32
    %c0_i32_0 = arith.constant 0 : i32
    %c0_i32_1 = arith.constant 0 : i32
    return %c0_i32, %c0_i32_0 : i32, i32
  }
  func.func @transform_3(%arg0: i32) -> (i32, i32) {
    %c0_i32 = arith.constant 0 : i32
    %c0_i32_0 = arith.constant 0 : i32
    return %arg0, %c0_i32 : i32, i32
  }
}

module attributes {stable_mosaic.version = 11 : i64} {
  func.func @_conv_relu_pool_kernel(%arg0: i32, %arg1: memref<4x32x256xf32, #tpu.memory_space<vmem>>, %arg2: memref<256x128xf32, #tpu.memory_space<vmem>>, %arg3: memref<1x128xf32, #tpu.memory_space<vmem>>, %arg4: memref<32x128xf32, #tpu.memory_space<vmem>>) attributes {dimension_semantics = [#tpu.dimension_semantics<parallel>], iteration_bounds = array<i64: 2>, scalar_prefetch = 0 : i64, scratch_operands = 0 : i64, tpu.core_type = #tpu.core_type<tc>, window_params = [{transform_indices = @transform_0, window_bounds = array<i64: 4, 32, 256>}, {pipeline_mode = #tpu.pipeline_mode<synchronous>, transform_indices = @transform_1, window_bounds = array<i64: 256, 128>}, {pipeline_mode = #tpu.pipeline_mode<synchronous>, transform_indices = @transform_2, window_bounds = array<i64: 1, 128>}, {transform_indices = @transform_3, window_bounds = array<i64: 32, 128>}]} {
    %c0 = arith.constant 0 : index
    %c0_0 = arith.constant 0 : index
    %c0_1 = arith.constant 0 : index
    %0 = vector.load %arg1[%c0, %c0_0, %c0_1] : memref<4x32x256xf32, #tpu.memory_space<vmem>>, vector<4x32x256xf32>
    %1 = vector.shape_cast %0 : vector<4x32x256xf32> to vector<128x256xf32>
    %c0_2 = arith.constant 0 : index
    %c0_3 = arith.constant 0 : index
    %2 = vector.load %arg2[%c0_2, %c0_3] : memref<256x128xf32, #tpu.memory_space<vmem>>, vector<256x128xf32>
    %cst = arith.constant dense<0.000000e+00> : vector<128x128xf32>
    %3 = tpu.matmul %1, %2, %cst {dimension_numbers = #tpu.dot_dimension_numbers<[1], [0], [0], [1], [0, 0, 1, 1], [], []>} : vector<128x256xf32>, vector<256x128xf32>, vector<128x128xf32> -> vector<128x128xf32>
    %4 = vector.shape_cast %3 : vector<128x128xf32> to vector<4x32x128xf32>
    %cst_4 = arith.constant dense<0xFF800000> : vector<32x128xf32>
    %5 = vector.multi_reduction <maximumf>, %4, %cst_4 [0] : vector<4x32x128xf32> to vector<32x128xf32>
    %c0_5 = arith.constant 0 : index
    %c0_6 = arith.constant 0 : index
    %6 = vector.load %arg3[%c0_5, %c0_6] : memref<1x128xf32, #tpu.memory_space<vmem>>, vector<1x128xf32>
    %7 = vector.broadcast %6 : vector<1x128xf32> to vector<32x128xf32>
    %8 = arith.addf %5, %7 : vector<32x128xf32>
    %cst_7 = arith.constant 0.000000e+00 : f32
    %9 = vector.broadcast %cst_7 : f32 to vector<32x128xf32>
    %10 = arith.maximumf %8, %9 : vector<32x128xf32>
    %c0_8 = arith.constant 0 : index
    %c0_9 = arith.constant 0 : index
    %11 = vector.load %arg4[%c0_8, %c0_9] : memref<32x128xf32, #tpu.memory_space<vmem>>, vector<32x128xf32>
    tpu.vector_store %arg4[%c0_8, %c0_9], %10 {strides = array<i32>} : memref<32x128xf32, #tpu.memory_space<vmem>>, vector<32x128xf32>,
    return
  }
  func.func @transform_0(%arg0: i32) -> (i32, i32, i32) {
    %c0_i32 = arith.constant 0 : i32
    %c0_i32_0 = arith.constant 0 : i32
    %c0_i32_1 = arith.constant 0 : i32
    return %c0_i32, %arg0, %c0_i32_0 : i32, i32, i32
  }
  func.func @transform_1(%arg0: i32) -> (i32, i32) {
    %c0_i32 = arith.constant 0 : i32
    %c0_i32_0 = arith.constant 0 : i32
    %c0_i32_1 = arith.constant 0 : i32
    return %c0_i32, %c0_i32_0 : i32, i32
  }
  func.func @transform_2(%arg0: i32) -> (i32, i32) {
    %c0_i32 = arith.constant 0 : i32
    %c0_i32_0 = arith.constant 0 : i32
    %c0_i32_1 = arith.constant 0 : i32
    return %c0_i32, %c0_i32_0 : i32, i32
  }
  func.func @transform_3(%arg0: i32) -> (i32, i32) {
    %c0_i32 = arith.constant 0 : i32
    %c0_i32_0 = arith.constant 0 : i32
    return %arg0, %c0_i32 : i32, i32
  }
}

module attributes {stable_mosaic.version = 11 : i64} {
  func.func @_fc_fused_kernel(%arg0: i32, %arg1: memref<8x512xf32, #tpu.memory_space<vmem>>, %arg2: memref<512x128xf32, #tpu.memory_space<vmem>>, %arg3: memref<1x128xf32, #tpu.memory_space<vmem>>, %arg4: memref<128x128xf32, #tpu.memory_space<vmem>>, %arg5: memref<1x128xf32, #tpu.memory_space<vmem>>, %arg6: memref<128x128xf32, #tpu.memory_space<vmem>>, %arg7: memref<1x128xf32, #tpu.memory_space<vmem>>, %arg8: memref<8x128xf32, #tpu.memory_space<vmem>>) attributes {dimension_semantics = [#tpu.dimension_semantics<parallel>], iteration_bounds = array<i64: 1>, scalar_prefetch = 0 : i64, scratch_operands = 0 : i64, tpu.core_type = #tpu.core_type<tc>, window_params = [{transform_indices = @transform_0, window_bounds = array<i64: 8, 512>}, {pipeline_mode = #tpu.pipeline_mode<synchronous>, transform_indices = @transform_1, window_bounds = array<i64: 512, 128>}, {pipeline_mode = #tpu.pipeline_mode<synchronous>, transform_indices = @transform_2, window_bounds = array<i64: 1, 128>}, {pipeline_mode = #tpu.pipeline_mode<synchronous>, transform_indices = @transform_3, window_bounds = array<i64: 128, 128>}, {pipeline_mode = #tpu.pipeline_mode<synchronous>, transform_indices = @transform_4, window_bounds = array<i64: 1, 128>}, {pipeline_mode = #tpu.pipeline_mode<synchronous>, transform_indices = @transform_5, window_bounds = array<i64: 128, 128>}, {pipeline_mode = #tpu.pipeline_mode<synchronous>, transform_indices = @transform_6, window_bounds = array<i64: 1, 128>}, {transform_indices = @transform_7, window_bounds = array<i64: 8, 128>}]} {
    %c0 = arith.constant 0 : index
    %c0_0 = arith.constant 0 : index
    %0 = vector.load %arg1[%c0, %c0_0] : memref<8x512xf32, #tpu.memory_space<vmem>>, vector<8x512xf32>
    %c0_1 = arith.constant 0 : index
    %c0_2 = arith.constant 0 : index
    %1 = vector.load %arg2[%c0_1, %c0_2] : memref<512x128xf32, #tpu.memory_space<vmem>>, vector<512x128xf32>
    %cst = arith.constant dense<0.000000e+00> : vector<8x128xf32>
    %2 = tpu.matmul %0, %1, %cst {dimension_numbers = #tpu.dot_dimension_numbers<[1], [0], [0], [1], [0, 0, 1, 1], [], []>} : vector<8x512xf32>, vector<512x128xf32>, vector<8x128xf32> -> vector<8x128xf32>
    %c0_3 = arith.constant 0 : index
    %c0_4 = arith.constant 0 : index
    %3 = vector.load %arg3[%c0_3, %c0_4] : memref<1x128xf32, #tpu.memory_space<vmem>>, vector<1x128xf32>
    %4 = vector.broadcast %3 : vector<1x128xf32> to vector<8x128xf32>
    %5 = arith.addf %2, %4 : vector<8x128xf32>
    %cst_5 = arith.constant 0.000000e+00 : f32
    %6 = vector.broadcast %cst_5 : f32 to vector<8x128xf32>
    %7 = arith.maximumf %5, %6 : vector<8x128xf32>
    %c0_6 = arith.constant 0 : index
    %c0_7 = arith.constant 0 : index
    %8 = vector.load %arg4[%c0_6, %c0_7] : memref<128x128xf32, #tpu.memory_space<vmem>>, vector<128x128xf32>
    %cst_8 = arith.constant dense<0.000000e+00> : vector<8x128xf32>
    %9 = tpu.matmul %7, %8, %cst_8 {dimension_numbers = #tpu.dot_dimension_numbers<[1], [0], [0], [1], [0, 0, 1, 1], [], []>} : vector<8x128xf32>, vector<128x128xf32>, vector<8x128xf32> -> vector<8x128xf32>
    %c0_9 = arith.constant 0 : index
    %c0_10 = arith.constant 0 : index
    %10 = vector.load %arg5[%c0_9, %c0_10] : memref<1x128xf32, #tpu.memory_space<vmem>>, vector<1x128xf32>
    %11 = vector.broadcast %10 : vector<1x128xf32> to vector<8x128xf32>
    %12 = arith.addf %9, %11 : vector<8x128xf32>
    %cst_11 = arith.constant 0.000000e+00 : f32
    %13 = vector.broadcast %cst_11 : f32 to vector<8x128xf32>
    %14 = arith.maximumf %12, %13 : vector<8x128xf32>
    %c0_12 = arith.constant 0 : index
    %c0_13 = arith.constant 0 : index
    %15 = vector.load %arg6[%c0_12, %c0_13] : memref<128x128xf32, #tpu.memory_space<vmem>>, vector<128x128xf32>
    %cst_14 = arith.constant dense<0.000000e+00> : vector<8x128xf32>
    %16 = tpu.matmul %14, %15, %cst_14 {dimension_numbers = #tpu.dot_dimension_numbers<[1], [0], [0], [1], [0, 0, 1, 1], [], []>} : vector<8x128xf32>, vector<128x128xf32>, vector<8x128xf32> -> vector<8x128xf32>
    %c0_15 = arith.constant 0 : index
    %c0_16 = arith.constant 0 : index
    %17 = vector.load %arg7[%c0_15, %c0_16] : memref<1x128xf32, #tpu.memory_space<vmem>>, vector<1x128xf32>
    %18 = vector.broadcast %17 : vector<1x128xf32> to vector<8x128xf32>
    %19 = arith.addf %16, %18 : vector<8x128xf32>
    %c0_17 = arith.constant 0 : index
    %c0_18 = arith.constant 0 : index
    %20 = vector.load %arg8[%c0_17, %c0_18] : memref<8x128xf32, #tpu.memory_space<vmem>>, vector<8x128xf32>
    tpu.vector_store %arg8[%c0_17, %c0_18], %19 {strides = array<i32>} : memref<8x128xf32, #tpu.memory_space<vmem>>, vector<8x128xf32>,
    return
  }
  func.func @transform_0(%arg0: i32) -> (i32, i32) {
    %c0_i32 = arith.constant 0 : i32
    %c0_i32_0 = arith.constant 0 : i32
    return %arg0, %c0_i32 : i32, i32
  }
  func.func @transform_1(%arg0: i32) -> (i32, i32) {
    %c0_i32 = arith.constant 0 : i32
    %c0_i32_0 = arith.constant 0 : i32
    %c0_i32_1 = arith.constant 0 : i32
    return %c0_i32, %c0_i32_0 : i32, i32
  }
  func.func @transform_2(%arg0: i32) -> (i32, i32) {
    %c0_i32 = arith.constant 0 : i32
    %c0_i32_0 = arith.constant 0 : i32
    %c0_i32_1 = arith.constant 0 : i32
    return %c0_i32, %c0_i32_0 : i32, i32
  }
  func.func @transform_3(%arg0: i32) -> (i32, i32) {
    %c0_i32 = arith.constant 0 : i32
    %c0_i32_0 = arith.constant 0 : i32
    %c0_i32_1 = arith.constant 0 : i32
    return %c0_i32, %c0_i32_0 : i32, i32
  }
  func.func @transform_4(%arg0: i32) -> (i32, i32) {
    %c0_i32 = arith.constant 0 : i32
    %c0_i32_0 = arith.constant 0 : i32
    %c0_i32_1 = arith.constant 0 : i32
    return %c0_i32, %c0_i32_0 : i32, i32
  }
  func.func @transform_5(%arg0: i32) -> (i32, i32) {
    %c0_i32 = arith.constant 0 : i32
    %c0_i32_0 = arith.constant 0 : i32
    %c0_i32_1 = arith.constant 0 : i32
    return %c0_i32, %c0_i32_0 : i32, i32
  }
  func.func @transform_6(%arg0: i32) -> (i32, i32) {
    %c0_i32 = arith.constant 0 : i32
    %c0_i32_0 = arith.constant 0 : i32
    %c0_i32_1 = arith.constant 0 : i32
    return %c0_i32, %c0_i32_0 : i32, i32
  }
  func.func @transform_7(%arg0: i32) -> (i32, i32) {
    %c0_i32 = arith.constant 0 : i32
    %c0_i32_0 = arith.constant 0 : i32
    return %arg0, %c0_i32 : i32, i32
  }
}

</mosaic_0001>

<bundles_post_ra>
// kernel: net_forward.3
= control target key start
LH: loop header
LB: loop body
LE: loop exit
PB: predicated region body
PF: predicated region fallthrough
CT: control target
= control target key end

     0   :  { %s1916_s12 = smov 0   ;;  %s1918_s13 = smov 0   ;;  %s2517_s0 = inlined_call_operand.vmem [shape: f32[4,400,128], index: 0, kind: input, shape index: {}]   ;;  %s2518_s1 = inlined_call_operand.vmem [shape: f32[128,128], index: 1, kind: input, shape index: {}]   ;;  %s2519_s2 = inlined_call_operand.vmem [shape: f32[1,128], index: 2, kind: input, shape index: {}]   ;;  %s2520_s3 = inlined_call_operand.vmem [shape: f32[400,128], index: 3, kind: output, shape index: {}]  }
   0x1   :  { %s1920_s14 = smov 0  }
   0x2 LB: > { %s1505_s15 = sadd.s32 4294967295, %s1894_s14   ;;  %s1933_s16 = sadd.s32 1, %s1894_s14   ;;  %s1894_s14 = sphi %s1920_s14, %s2523_s14   ;;  %s1890_s13 = sphi %s1918_s13, %s2522_s13   ;;  %s1886_s12 = sphi %s1916_s12, %s2521_s12  }
   0x3   : > { %s17_s17 = ssub.s32 %s1894_s14, %s1933_s16  ;;  %s20_s18 = sadd.s32 1, %s1890_s13 }
   0x4   : > { %p18_p0 = scmp.eq.s32.totalorder %s17_s17, 0  ;;  %p27_p1 = scmp.ne.s32.totalorder %s1890_s13, %s1886_s12 }
   0x5   : > { %p28_p2 = scmp.eq.s32.totalorder %s1894_s14, 0  ;;  %p1508_p4 = scmp.ge.s32.totalorder %s1894_s14, 2 }
   0x6   : > { %s1942_s19 = scalar_select %p18_p0, %s1890_s13, %s20_s18  }
   0x7   : > { %p29_p3 = por %p28_p2, %p27_p1  ;;  %127 = sbr.rel (%p1508_p4) target bundleno = 67 (0x43), region = 24 }
   0xc   : > { %130 = sbr.rel (!%p29_p3) target bundleno = 67 (0x43), region = 28  ;;  %s132_s20 = sand.u32 (%p29_p3), 1, %s1890_s13  }
   0xd   : > { %s1515_s21 = smul.u32 (%p29_p3), 200, %s1894_s14 }
   0xe   : > { %s1846_s22 = smul.u32 (%p29_p3), 800, %s132_s20 }
   0xf   : > { %s1950_s25 = scalar_lea.vmem (%p29_p3), %s2517_s0, %s1515_s21 }
  0x10   : > { %v364_v0 = vld [vmem:[%s1950_s25] sm:$0xff] (%p29_p3)  ;;  %v366_v1 = vld [vmem:[%s1950_s25 + $0x8] sm:$0xff] (%p29_p3)  ;;  %v368_v2 = vld [vmem:[%s1950_s25 + $0x10] sm:$0xff] (%p29_p3)  ;;  %s1955_s26 = scalar_lea.vmem (%p29_p3), [#allocation2], %s1846_s22 }
  0x11   : > { %365 = vst [vmem:[%s1955_s26] sm:$0xff] %v364_v0  ;;  %367 = vst [vmem:[%s1955_s26 + $0x8] sm:$0xff] %v366_v1  ;;  %v370_v3 = vld [vmem:[%s1950_s25 + $0x18] sm:$0xff]  ;;  %v372_v4 = vld [vmem:[%s1950_s25 + $0x20] sm:$0xff] }
  0x12   : > { %369 = vst [vmem:[%s1955_s26 + $0x10] sm:$0xff] %v368_v2  ;;  %v374_v5 = vld [vmem:[%s1950_s25 + $0x28] sm:$0xff]  ;;  %371 = vst [vmem:[%s1955_s26 + $0x18] sm:$0xff] %v370_v3  ;;  %v376_v6 = vld [vmem:[%s1950_s25 + $0x30] sm:$0xff] }
  0x13   : > { %373 = vst [vmem:[%s1955_s26 + $0x20] sm:$0xff] %v372_v4  ;;  %375 = vst [vmem:[%s1955_s26 + $0x28] sm:$0xff] %v374_v5  ;;  %v378_v7 = vld [vmem:[%s1950_s25 + $0x38] sm:$0xff]  ;;  %v380_v8 = vld [vmem:[%s1950_s25 + $0x40] sm:$0xff] }
  0x14   : > { %377 = vst [vmem:[%s1955_s26 + $0x30] sm:$0xff] %v376_v6  ;;  %379 = vst [vmem:[%s1955_s26 + $0x38] sm:$0xff] %v378_v7  ;;  %v382_v9 = vld [vmem:[%s1950_s25 + $0x48] sm:$0xff]  ;;  %v384_v10 = vld [vmem:[%s1950_s25 + $0x50] sm:$0xff] }
  0x15   : > { %381 = vst [vmem:[%s1955_s26 + $0x40] sm:$0xff] %v380_v8  ;;  %v386_v11 = vld [vmem:[%s1950_s25 + $0x58] sm:$0xff]  ;;  %383 = vst [vmem:[%s1955_s26 + $0x48] sm:$0xff] %v382_v9  ;;  %v388_v12 = vld [vmem:[%s1950_s25 + $0x60] sm:$0xff] }
  0x16   : > { %385 = vst [vmem:[%s1955_s26 + $0x50] sm:$0xff] %v384_v10  ;;  %387 = vst [vmem:[%s1955_s26 + $0x58] sm:$0xff] %v386_v11  ;;  %v390_v13 = vld [vmem:[%s1950_s25 + $0x68] sm:$0xff]  ;;  %v392_v14 = vld [vmem:[%s1950_s25 + $0x70] sm:$0xff] }
  0x17   : > { %389 = vst [vmem:[%s1955_s26 + $0x60] sm:$0xff] %v388_v12  ;;  %391 = vst [vmem:[%s1955_s26 + $0x68] sm:$0xff] %v390_v13  ;;  %v394_v15 = vld [vmem:[%s1950_s25 + $0x78] sm:$0xff]  ;;  %v396_v16 = vld [vmem:[%s1950_s25 + $0x80] sm:$0xff] }
  0x18   : > { %393 = vst [vmem:[%s1955_s26 + $0x70] sm:$0xff] %v392_v14  ;;  %v398_v17 = vld [vmem:[%s1950_s25 + $0x88] sm:$0xff]  ;;  %395 = vst [vmem:[%s1955_s26 + $0x78] sm:$0xff] %v394_v15  ;;  %v400_v18 = vld [vmem:[%s1950_s25 + $0x90] sm:$0xff] }
  0x19   : > { %397 = vst [vmem:[%s1955_s26 + $0x80] sm:$0xff] %v396_v16  ;;  %399 = vst [vmem:[%s1955_s26 + $0x88] sm:$0xff] %v398_v17  ;;  %v402_v19 = vld [vmem:[%s1950_s25 + $0x98] sm:$0xff]  ;;  %v404_v20 = vld [vmem:[%s1950_s25 + $0xa0] sm:$0xff] }
  0x1a   : > { %401 = vst [vmem:[%s1955_s26 + $0x90] sm:$0xff] %v400_v18  ;;  %403 = vst [vmem:[%s1955_s26 + $0x98] sm:$0xff] %v402_v19  ;;  %v406_v21 = vld [vmem:[%s1950_s25 + $0xa8] sm:$0xff]  ;;  %v408_v22 = vld [vmem:[%s1950_s25 + $0xb0] sm:$0xff] }
  0x1b   : > { %405 = vst [vmem:[%s1955_s26 + $0xa0] sm:$0xff] %v404_v20  ;;  %v410_v23 = vld [vmem:[%s1950_s25 + $0xb8] sm:$0xff]  ;;  %407 = vst [vmem:[%s1955_s26 + $0xa8] sm:$0xff] %v406_v21  ;;  %v412_v24 = vld [vmem:[%s1950_s25 + $0xc0] sm:$0xff] }
  0x1c   : > { %409 = vst [vmem:[%s1955_s26 + $0xb0] sm:$0xff] %v408_v22  ;;  %411 = vst [vmem:[%s1955_s26 + $0xb8] sm:$0xff] %v410_v23  ;;  %v414_v25 = vld [vmem:[%s1950_s25 + $0x190] sm:$0xff]  ;;  %v416_v26 = vld [vmem:[%s1950_s25 + $0x198] sm:$0xff] }
  0x1d   : > { %413 = vst [vmem:[%s1955_s26 + $0xc0] sm:$0xff] %v412_v24  ;;  %415 = vst [vmem:[%s1955_s26 + $0xc8] sm:$0xff] %v414_v25  ;;  %v418_v27 = vld [vmem:[%s1950_s25 + $0x1a0] sm:$0xff]  ;;  %v420_v28 = vld [vmem:[%s1950_s25 + $0x1a8] sm:$0xff] }
  0x1e   : > { %417 = vst [vmem:[%s1955_s26 + $0xd0] sm:$0xff] %v416_v26  ;;  %v422_v29 = vld [vmem:[%s1950_s25 + $0x1b0] sm:$0xff]  ;;  %419 = vst [vmem:[%s1955_s26 + $0xd8] sm:$0xff] %v418_v27  ;;  %v424_v30 = vld [vmem:[%s1950_s25 + $0x1b8] sm:$0xff] }
  0x1f   : > { %421 = vst [vmem:[%s1955_s26 + $0xe0] sm:$0xff] %v420_v28  ;;  %423 = vst [vmem:[%s1955_s26 + $0xe8] sm:$0xff] %v422_v29  ;;  %v426_v31 = vld [vmem:[%s1950_s25 + $0x1c0] sm:$0xff]  ;;  %v428_v32 = vld [vmem:[%s1950_s25 + $0x1c8] sm:$0xff] }
  0x20   : > { %425 = vst [vmem:[%s1955_s26 + $0xf0] sm:$0xff] %v424_v30  ;;  %427 = vst [vmem:[%s1955_s26 + $0xf8] sm:$0xff] %v426_v31  ;;  %v430_v33 = vld [vmem:[%s1950_s25 + $0x1d0] sm:$0xff]  ;;  %v432_v34 = vld [vmem:[%s1950_s25 + $0x1d8] sm:$0xff] }
  0x21   : > { %429 = vst [vmem:[%s1955_s26 + $0x100] sm:$0xff] %v428_v32  ;;  %v434_v35 = vld [vmem:[%s1950_s25 + $0x1e0] sm:$0xff]  ;;  %431 = vst [vmem:[%s1955_s26 + $0x108] sm:$0xff] %v430_v33  ;;  %v436_v36 = vld [vmem:[%s1950_s25 + $0x1e8] sm:$0xff] }
  0x22   : > { %433 = vst [vmem:[%s1955_s26 + $0x110] sm:$0xff] %v432_v34  ;;  %435 = vst [vmem:[%s1955_s26 + $0x118] sm:$0xff] %v434_v35  ;;  %v438_v37 = vld [vmem:[%s1950_s25 + $0x1f0] sm:$0xff]  ;;  %v440_v38 = vld [vmem:[%s1950_s25 + $0x1f8] sm:$0xff] }
  0x23   : > { %437 = vst [vmem:[%s1955_s26 + $0x120] sm:$0xff] %v436_v36  ;;  %439 = vst [vmem:[%s1955_s26 + $0x128] sm:$0xff] %v438_v37  ;;  %v442_v39 = vld [vmem:[%s1950_s25 + $0x200] sm:$0xff]  ;;  %v444_v40 = vld [vmem:[%s1950_s25 + $0x208] sm:$0xff] }
  0x24   : > { %441 = vst [vmem:[%s1955_s26 + $0x130] sm:$0xff] %v440_v38  ;;  %v446_v41 = vld [vmem:[%s1950_s25 + $0x210] sm:$0xff]  ;;  %443 = vst [vmem:[%s1955_s26 + $0x138] sm:$0xff] %v442_v39  ;;  %v448_v42 = vld [vmem:[%s1950_s25 + $0x218] sm:$0xff] }
  0x25   : > { %445 = vst [vmem:[%s1955_s26 + $0x140] sm:$0xff] %v444_v40  ;;  %447 = vst [vmem:[%s1955_s26 + $0x148] sm:$0xff] %v446_v41  ;;  %v450_v43 = vld [vmem:[%s1950_s25 + $0x220] sm:$0xff]  ;;  %v452_v44 = vld [vmem:[%s1950_s25 + $0x228] sm:$0xff] }
  0x26   : > { %449 = vst [vmem:[%s1955_s26 + $0x150] sm:$0xff] %v448_v42  ;;  %451 = vst [vmem:[%s1955_s26 + $0x158] sm:$0xff] %v450_v43  ;;  %v454_v45 = vld [vmem:[%s1950_s25 + $0x230] sm:$0xff]  ;;  %v456_v46 = vld [vmem:[%s1950_s25 + $0x238] sm:$0xff] }
  0x27   : > { %453 = vst [vmem:[%s1955_s26 + $0x160] sm:$0xff] %v452_v44  ;;  %v458_v47 = vld [vmem:[%s1950_s25 + $0x240] sm:$0xff]  ;;  %455 = vst [vmem:[%s1955_s26 + $0x168] sm:$0xff] %v454_v45  ;;  %v460_v48 = vld [vmem:[%s1950_s25 + $0x248] sm:$0xff] }
  0x28   : > { %457 = vst [vmem:[%s1955_s26 + $0x170] sm:$0xff] %v456_v46  ;;  %459 = vst [vmem:[%s1955_s26 + $0x178] sm:$0xff] %v458_v47  ;;  %v462_v49 = vld [vmem:[%s1950_s25 + $0x250] sm:$0xff]  ;;  %v464_v50 = vld [vmem:[%s1950_s25 + $0x320] sm:$0xff] }
  0x29   : > { %461 = vst [vmem:[%s1955_s26 + $0x180] sm:$0xff] %v460_v48  ;;  %463 = vst [vmem:[%s1955_s26 + $0x188] sm:$0xff] %v462_v49  ;;  %v466_v51 = vld [vmem:[%s1950_s25 + $0x328] sm:$0xff]  ;;  %v468_v52 = vld [vmem:[%s1950_s25 + $0x330] sm:$0xff] }
  0x2a   : > { %465 = vst [vmem:[%s1955_s26 + $0x190] sm:$0xff] %v464_v50  ;;  %v470_v53 = vld [vmem:[%s1950_s25 + $0x338] sm:$0xff]  ;;  %467 = vst [vmem:[%s1955_s26 + $0x198] sm:$0xff] %v466_v51  ;;  %v472_v54 = vld [vmem:[%s1950_s25 + $0x340] sm:$0xff] }
  0x2b   : > { %469 = vst [vmem:[%s1955_s26 + $0x1a0] sm:$0xff] %v468_v52  ;;  %471 = vst [vmem:[%s1955_s26 + $0x1a8] sm:$0xff] %v470_v53  ;;  %v474_v55 = vld [vmem:[%s1950_s25 + $0x348] sm:$0xff]  ;;  %v476_v56 = vld [vmem:[%s1950_s25 + $0x350] sm:$0xff] }
  0x2c   : > { %473 = vst [vmem:[%s1955_s26 + $0x1b0] sm:$0xff] %v472_v54  ;;  %475 = vst [vmem:[%s1955_s26 + $0x1b8] sm:$0xff] %v474_v55  ;;  %v478_v57 = vld [vmem:[%s1950_s25 + $0x358] sm:$0xff]  ;;  %v480_v58 = vld [vmem:[%s1950_s25 + $0x360] sm:$0xff] }
  0x2d   : > { %477 = vst [vmem:[%s1955_s26 + $0x1c0] sm:$0xff] %v476_v56  ;;  %v482_v59 = vld [vmem:[%s1950_s25 + $0x368] sm:$0xff]  ;;  %479 = vst [vmem:[%s1955_s26 + $0x1c8] sm:$0xff] %v478_v57  ;;  %v484_v60 = vld [vmem:[%s1950_s25 + $0x370] sm:$0xff] }
  0x2e   : > { %481 = vst [vmem:[%s1955_s26 + $0x1d0] sm:$0xff] %v480_v58  ;;  %483 = vst [vmem:[%s1955_s26 + $0x1d8] sm:$0xff] %v482_v59  ;;  %v486_v61 = vld [vmem:[%s1950_s25 + $0x378] sm:$0xff]  ;;  %v488_v62 = vld [vmem:[%s1950_s25 + $0x380] sm:$0xff] }
  0x2f   : > { %485 = vst [vmem:[%s1955_s26 + $0x1e0] sm:$0xff] %v484_v60  ;;  %487 = vst [vmem:[%s1955_s26 + $0x1e8] sm:$0xff] %v486_v61  ;;  %v490_v63 = vld [vmem:[%s1950_s25 + $0x388] sm:$0xff]  ;;  %v492_v0 = vld [vmem:[%s1950_s25 + $0x390] sm:$0xff] }
  0x30   : > { %489 = vst [vmem:[%s1955_s26 + $0x1f0] sm:$0xff] %v488_v62  ;;  %v494_v1 = vld [vmem:[%s1950_s25 + $0x398] sm:$0xff]  ;;  %491 = vst [vmem:[%s1955_s26 + $0x1f8] sm:$0xff] %v490_v63  ;;  %v496_v2 = vld [vmem:[%s1950_s25 + $0x3a0] sm:$0xff] }
  0x31   : > { %493 = vst [vmem:[%s1955_s26 + $0x200] sm:$0xff] %v492_v0  ;;  %495 = vst [vmem:[%s1955_s26 + $0x208] sm:$0xff] %v494_v1  ;;  %v498_v3 = vld [vmem:[%s1950_s25 + $0x3a8] sm:$0xff]  ;;  %v500_v4 = vld [vmem:[%s1950_s25 + $0x3b0] sm:$0xff] }
  0x32   : > { %497 = vst [vmem:[%s1955_s26 + $0x210] sm:$0xff] %v496_v2  ;;  %499 = vst [vmem:[%s1955_s26 + $0x218] sm:$0xff] %v498_v3  ;;  %v502_v5 = vld [vmem:[%s1950_s25 + $0x3b8] sm:$0xff]  ;;  %v504_v6 = vld [vmem:[%s1950_s25 + $0x3c0] sm:$0xff] }
  0x33   : > { %501 = vst [vmem:[%s1955_s26 + $0x220] sm:$0xff] %v500_v4  ;;  %v506_v7 = vld [vmem:[%s1950_s25 + $0x3c8] sm:$0xff]  ;;  %503 = vst [vmem:[%s1955_s26 + $0x228] sm:$0xff] %v502_v5  ;;  %v508_v8 = vld [vmem:[%s1950_s25 + $0x3d0] sm:$0xff] }
  0x34   : > { %505 = vst [vmem:[%s1955_s26 + $0x230] sm:$0xff] %v504_v6  ;;  %507 = vst [vmem:[%s1955_s26 + $0x238] sm:$0xff] %v506_v7  ;;  %v510_v9 = vld [vmem:[%s1950_s25 + $0x3d8] sm:$0xff]  ;;  %v512_v10 = vld [vmem:[%s1950_s25 + $0x3e0] sm:$0xff] }
  0x35   : > { %509 = vst [vmem:[%s1955_s26 + $0x240] sm:$0xff] %v508_v8  ;;  %511 = vst [vmem:[%s1955_s26 + $0x248] sm:$0xff] %v510_v9  ;;  %v514_v11 = vld [vmem:[%s1950_s25 + $0x4b0] sm:$0xff]  ;;  %v516_v12 = vld [vmem:[%s1950_s25 + $0x4b8] sm:$0xff] }
  0x36   : > { %513 = vst [vmem:[%s1955_s26 + $0x250] sm:$0xff] %v512_v10  ;;  %v518_v13 = vld [vmem:[%s1950_s25 + $0x4c0] sm:$0xff]  ;;  %515 = vst [vmem:[%s1955_s26 + $0x258] sm:$0xff] %v514_v11  ;;  %v520_v14 = vld [vmem:[%s1950_s25 + $0x4c8] sm:$0xff] }
  0x37   : > { %517 = vst [vmem:[%s1955_s26 + $0x260] sm:$0xff] %v516_v12  ;;  %519 = vst [vmem:[%s1955_s26 + $0x268] sm:$0xff] %v518_v13  ;;  %v522_v15 = vld [vmem:[%s1950_s25 + $0x4d0] sm:$0xff]  ;;  %v524_v16 = vld [vmem:[%s1950_s25 + $0x4d8] sm:$0xff] }
  0x38   : > { %521 = vst [vmem:[%s1955_s26 + $0x270] sm:$0xff] %v520_v14  ;;  %523 = vst [vmem:[%s1955_s26 + $0x278] sm:$0xff] %v522_v15  ;;  %v526_v17 = vld [vmem:[%s1950_s25 + $0x4e0] sm:$0xff]  ;;  %v528_v18 = vld [vmem:[%s1950_s25 + $0x4e8] sm:$0xff] }
  0x39   : > { %525 = vst [vmem:[%s1955_s26 + $0x280] sm:$0xff] %v524_v16  ;;  %v530_v19 = vld [vmem:[%s1950_s25 + $0x4f0] sm:$0xff]  ;;  %527 = vst [vmem:[%s1955_s26 + $0x288] sm:$0xff] %v526_v17  ;;  %v532_v20 = vld [vmem:[%s1950_s25 + $0x4f8] sm:$0xff] }
  0x3a   : > { %529 = vst [vmem:[%s1955_s26 + $0x290] sm:$0xff] %v528_v18  ;;  %531 = vst [vmem:[%s1955_s26 + $0x298] sm:$0xff] %v530_v19  ;;  %v534_v21 = vld [vmem:[%s1950_s25 + $0x500] sm:$0xff]  ;;  %v536_v22 = vld [vmem:[%s1950_s25 + $0x508] sm:$0xff] }
  0x3b   : > { %533 = vst [vmem:[%s1955_s26 + $0x2a0] sm:$0xff] %v532_v20  ;;  %535 = vst [vmem:[%s1955_s26 + $0x2a8] sm:$0xff] %v534_v21  ;;  %v538_v23 = vld [vmem:[%s1950_s25 + $0x510] sm:$0xff]  ;;  %v540_v24 = vld [vmem:[%s1950_s25 + $0x518] sm:$0xff] }
  0x3c   : > { %537 = vst [vmem:[%s1955_s26 + $0x2b0] sm:$0xff] %v536_v22  ;;  %v542_v25 = vld [vmem:[%s1950_s25 + $0x520] sm:$0xff]  ;;  %539 = vst [vmem:[%s1955_s26 + $0x2b8] sm:$0xff] %v538_v23  ;;  %v544_v26 = vld [vmem:[%s1950_s25 + $0x528] sm:$0xff] }
  0x3d   : > { %541 = vst [vmem:[%s1955_s26 + $0x2c0] sm:$0xff] %v540_v24  ;;  %543 = vst [vmem:[%s1955_s26 + $0x2c8] sm:$0xff] %v542_v25  ;;  %v546_v27 = vld [vmem:[%s1950_s25 + $0x530] sm:$0xff]  ;;  %v548_v28 = vld [vmem:[%s1950_s25 + $0x538] sm:$0xff] }
  0x3e   : > { %545 = vst [vmem:[%s1955_s26 + $0x2d0] sm:$0xff] %v544_v26  ;;  %547 = vst [vmem:[%s1955_s26 + $0x2d8] sm:$0xff] %v546_v27  ;;  %v550_v29 = vld [vmem:[%s1950_s25 + $0x540] sm:$0xff]  ;;  %v552_v30 = vld [vmem:[%s1950_s25 + $0x548] sm:$0xff] }
  0x3f   : > { %549 = vst [vmem:[%s1955_s26 + $0x2e0] sm:$0xff] %v548_v28  ;;  %v554_v31 = vld [vmem:[%s1950_s25 + $0x550] sm:$0xff]  ;;  %551 = vst [vmem:[%s1955_s26 + $0x2e8] sm:$0xff] %v550_v29  ;;  %v556_v32 = vld [vmem:[%s1950_s25 + $0x558] sm:$0xff] }
  0x40   : > { %553 = vst [vmem:[%s1955_s26 + $0x2f0] sm:$0xff] %v552_v30  ;;  %555 = vst [vmem:[%s1955_s26 + $0x2f8] sm:$0xff] %v554_v31  ;;  %v558_v33 = vld [vmem:[%s1950_s25 + $0x560] sm:$0xff]  ;;  %v560_v34 = vld [vmem:[%s1950_s25 + $0x568] sm:$0xff] }
  0x41   : > { %557 = vst [vmem:[%s1955_s26 + $0x300] sm:$0xff] %v556_v32  ;;  %559 = vst [vmem:[%s1955_s26 + $0x308] sm:$0xff] %v558_v33  ;;  %v562_v35 = vld [vmem:[%s1950_s25 + $0x570] sm:$0xff] }
  0x42   : > { %561 = vst [vmem:[%s1955_s26 + $0x310] sm:$0xff] %v560_v34  ;;  %563 = vst [vmem:[%s1955_s26 + $0x318] sm:$0xff] %v562_v35 }
  0x43 PF: > { %p1510_p5 = scmp.ge.s32.totalorder %s1894_s14, 1  ;;  %p568_p6 = scmp.lt.s32.totalorder %s1894_s14, 3 }
  0x45   : > { %p569_p7 = pnand %p1510_p5, %p568_p6 }
  0x46   : > { %s575_s28 = sand.u32 (!%p569_p7), 1, %s1886_s12   ;;  %s599_s18 = smul.u32 (!%p569_p7), 25, %s1505_s15 }
  0x47   : > { %572 = sbr.rel (%p569_p7) target bundleno = 411 (0x19b), region = 66 }
  0x48   : > { %s1847_s4 = smul.u32 (!%p569_p7), 800, %s575_s28  ;;  %p600_p8 = scmp.lt.s32.totalorder (!%p569_p7), %s599_s18, 49 }
  0x4a   : > { %s2205_s17 = scalar_lea.vmem (!%p569_p7), [#allocation2], %s1847_s4 }
  0x4c   : > { %v720_v36 = vld [vmem:[%s2518_s1 + $0x78] sm:$0xff]  ;;  %v719_v37 = vld [vmem:[%s2518_s1 + $0x70] sm:$0xff]  ;;  %v718_v38 = vld [vmem:[%s2518_s1 + $0x68] sm:$0xff]  ;;  %s2525_s18 = smov (!%p600_p8, %s599_s18), 49 }
  0x4d   : > { %1632 = vmatprep.subr.mxu0 %v720_v36  ;;  %1814 = vmatprep.subr.mxu1 %v720_v36  ;;  %v717_v39 = vld [vmem:[%s2518_s1 + $0x60] sm:$0xff]  ;;  %v716_v40 = vld [vmem:[%s2518_s1 + $0x58] sm:$0xff]  ;;  %v715_v41 = vld [vmem:[%s2518_s1 + $0x50] sm:$0xff]  ;;  %s1511_s20 = sshll.u32 %s2525_s18, 3 }
  0x4e   : > { %1633 = vmatpush3.msra.mxu0 %v720_v36  ;;  %1830 = vmatpush3.msra.mxu1 %v720_v36  ;;  %v714_v42 = vld [vmem:[%s2518_s1 + $0x48] sm:$0xff]  ;;  %v713_v43 = vld [vmem:[%s2518_s1 + $0x40] sm:$0xff]  ;;  %v712_v44 = vld [vmem:[%s2518_s1 + $0x38] sm:$0xff]  ;;  %s2411_s23 = scalar_lea.vmem %s2520_s3, %s1511_s20 }
  0x4f   : > { %1634 = vmatprep.subr.mxu0 %v719_v37  ;;  %1815 = vmatprep.subr.mxu1 %v719_v37  ;;  %v711_v45 = vld [vmem:[%s2518_s1 + $0x30] sm:$0xff]  ;;  %v710_v46 = vld [vmem:[%s2518_s1 + $0x28] sm:$0xff]  ;;  %v709_v47 = vld [vmem:[%s2518_s1 + $0x20] sm:$0xff] }
  0x50   : > { %1635 = vmatpush3.msra.mxu0 %v719_v37  ;;  %1831 = vmatpush3.msra.mxu1 %v719_v37  ;;  %v708_v48 = vld [vmem:[%s2518_s1 + $0x18] sm:$0xff]  ;;  %v707_v49 = vld [vmem:[%s2518_s1 + $0x10] sm:$0xff]  ;;  %v706_v50 = vld [vmem:[%s2518_s1 + $0x8] sm:$0xff] }
  0x51   : > { %1636 = vmatprep.subr.mxu0 %v718_v38  ;;  %1816 = vmatprep.subr.mxu1 %v718_v38  ;;  %v705_v51 = vld [vmem:[%s2518_s1] sm:$0xff]  ;;  %v606_v53 = vld [vmem:[%s2205_s17 + $0x8] sm:$0xff]  ;;  %v655_v54 = vld [vmem:[%s2205_s17 + $0x190] sm:$0xff] }
  0x52   : > { %1637 = vmatpush3.msra.mxu0 %v718_v38  ;;  %1832 = vmatpush3.msra.mxu1 %v718_v38  ;;  %v605_v52 = vld [vmem:[%s2205_s17] sm:$0xff]  ;;  %v607_v55 = vld [vmem:[%s2205_s17 + $0x10] sm:$0xff]  ;;  %v656_v56 = vld [vmem:[%s2205_s17 + $0x198] sm:$0xff] }
  0x53   : > { %1638 = vmatprep.subr.mxu0 %v717_v39  ;;  %1817 = vmatprep.subr.mxu1 %v717_v39  ;;  %v657_v57 = vld [vmem:[%s2205_s17 + $0x1a0] sm:$0xff]  ;;  %v608_v58 = vld [vmem:[%s2205_s17 + $0x18] sm:$0xff]  ;;  %v658_v60 = vld [vmem:[%s2205_s17 + $0x1a8] sm:$0xff] }
  0x54   : > { %1639 = vmatpush3.msra.mxu0 %v717_v39  ;;  %1833 = vmatpush3.msra.mxu1 %v717_v39  ;;  %v609_v59 = vld [vmem:[%s2205_s17 + $0x20] sm:$0xff]  ;;  %v659_v61 = vld [vmem:[%s2205_s17 + $0x1b0] sm:$0xff]  ;;  %v610_v62 = vld [vmem:[%s2205_s17 + $0x28] sm:$0xff] }
  0x55   : > { %1640 = vmatprep.subr.mxu0 %v716_v40  ;;  %1818 = vmatprep.subr.mxu1 %v716_v40  ;;  %v611_v63 = vld [vmem:[%s2205_s17 + $0x30] sm:$0xff]  ;;  %v660_v0 = vld [vmem:[%s2205_s17 + $0x1b8] sm:$0xff]  ;;  %v661_v1 = vld [vmem:[%s2205_s17 + $0x1c0] sm:$0xff] }
  0x56   : > { %1641 = vmatpush3.msra.mxu0 %v716_v40  ;;  %1834 = vmatpush3.msra.mxu1 %v716_v40  ;;  %v612_v2 = vld [vmem:[%s2205_s17 + $0x38] sm:$0xff]  ;;  %v613_v3 = vld [vmem:[%s2205_s17 + $0x40] sm:$0xff]  ;;  %v662_v4 = vld [vmem:[%s2205_s17 + $0x1c8] sm:$0xff] }
  0x57   : > { %1642 = vmatprep.subr.mxu0 %v715_v41  ;;  %1819 = vmatprep.subr.mxu1 %v715_v41  ;;  %v663_v5 = vld [vmem:[%s2205_s17 + $0x1d0] sm:$0xff]  ;;  %v614_v6 = vld [vmem:[%s2205_s17 + $0x48] sm:$0xff]  ;;  %v664_v8 = vld [vmem:[%s2205_s17 + $0x1d8] sm:$0xff] }
  0x58   : > { %1643 = vmatpush3.msra.mxu0 %v715_v41  ;;  %1835 = vmatpush3.msra.mxu1 %v715_v41  ;;  %v615_v7 = vld [vmem:[%s2205_s17 + $0x50] sm:$0xff]  ;;  %v665_v9 = vld [vmem:[%s2205_s17 + $0x1e0] sm:$0xff]  ;;  %v616_v10 = vld [vmem:[%s2205_s17 + $0x58] sm:$0xff] }
  0x59   : > { %1644 = vmatprep.subr.mxu0 %v714_v42  ;;  %1820 = vmatprep.subr.mxu1 %v714_v42  ;;  %v617_v11 = vld [vmem:[%s2205_s17 + $0x60] sm:$0xff]  ;;  %v666_v12 = vld [vmem:[%s2205_s17 + $0x1e8] sm:$0xff]  ;;  %v667_v13 = vld [vmem:[%s2205_s17 + $0x1f0] sm:$0xff] }
  0x5a   : > { %1645 = vmatpush3.msra.mxu0 %v714_v42  ;;  %1836 = vmatpush3.msra.mxu1 %v714_v42  ;;  %v618_v14 = vld [vmem:[%s2205_s17 + $0x68] sm:$0xff]  ;;  %v619_v15 = vld [vmem:[%s2205_s17 + $0x70] sm:$0xff]  ;;  %v668_v16 = vld [vmem:[%s2205_s17 + $0x1f8] sm:$0xff] }
  0x5b   : > { %1646 = vmatprep.subr.mxu0 %v713_v43  ;;  %1821 = vmatprep.subr.mxu1 %v713_v43  ;;  %v669_v17 = vld [vmem:[%s2205_s17 + $0x200] sm:$0xff]  ;;  %v620_v18 = vld [vmem:[%s2205_s17 + $0x78] sm:$0xff]  ;;  %v670_v20 = vld [vmem:[%s2205_s17 + $0x208] sm:$0xff] }
  0x5c   : > { %1647 = vmatpush3.msra.mxu0 %v713_v43  ;;  %1837 = vmatpush3.msra.mxu1 %v713_v43  ;;  %v621_v19 = vld [vmem:[%s2205_s17 + $0x80] sm:$0xff]  ;;  %v671_v21 = vld [vmem:[%s2205_s17 + $0x210] sm:$0xff]  ;;  %v622_v22 = vld [vmem:[%s2205_s17 + $0x88] sm:$0xff] }
  0x5d   : > { %1648 = vmatprep.subr.mxu0 %v712_v44  ;;  %1822 = vmatprep.subr.mxu1 %v712_v44  ;;  %v623_v23 = vld [vmem:[%s2205_s17 + $0x90] sm:$0xff]  ;;  %v672_v24 = vld [vmem:[%s2205_s17 + $0x218] sm:$0xff]  ;;  %v673_v25 = vld [vmem:[%s2205_s17 + $0x220] sm:$0xff] }
  0x5e   : > { %1649 = vmatpush3.msra.mxu0 %v712_v44  ;;  %1838 = vmatpush3.msra.mxu1 %v712_v44  ;;  %v624_v26 = vld [vmem:[%s2205_s17 + $0x98] sm:$0xff]  ;;  %v625_v27 = vld [vmem:[%s2205_s17 + $0xa0] sm:$0xff]  ;;  %v674_v28 = vld [vmem:[%s2205_s17 + $0x228] sm:$0xff] }
  0x5f   : > { %1650 = vmatprep.subr.mxu0 %v711_v45  ;;  %1823 = vmatprep.subr.mxu1 %v711_v45  ;;  %v675_v29 = vld [vmem:[%s2205_s17 + $0x230] sm:$0xff]  ;;  %v626_v30 = vld [vmem:[%s2205_s17 + $0xa8] sm:$0xff]  ;;  %v676_v32 = vld [vmem:[%s2205_s17 + $0x238] sm:$0xff] }
  0x60   : > { %1651 = vmatpush3.msra.mxu0 %v711_v45  ;;  %1839 = vmatpush3.msra.mxu1 %v711_v45  ;;  %v627_v31 = vld [vmem:[%s2205_s17 + $0xb0] sm:$0xff]  ;;  %v677_v33 = vld [vmem:[%s2205_s17 + $0x240] sm:$0xff]  ;;  %v628_v34 = vld [vmem:[%s2205_s17 + $0xb8] sm:$0xff] }
  0x61   : > { %1652 = vmatprep.subr.mxu0 %v710_v46  ;;  %1824 = vmatprep.subr.mxu1 %v710_v46  ;;  %v629_v35 = vld [vmem:[%s2205_s17 + $0xc0] sm:$0xff]  ;;  %v678_v36 = vld [vmem:[%s2205_s17 + $0x248] sm:$0xff]  ;;  %v679_v37 = vld [vmem:[%s2205_s17 + $0x250] sm:$0xff] }
  0x62   : > { %1653 = vmatpush3.msra.mxu0 %v710_v46  ;;  %1840 = vmatpush3.msra.mxu1 %v710_v46  ;;  %v630_v38 = vld [vmem:[%s2205_s17 + $0xc8] sm:$0xff]  ;;  %v631_v39 = vld [vmem:[%s2205_s17 + $0xd0] sm:$0xff]  ;;  %v680_v40 = vld [vmem:[%s2205_s17 + $0x258] sm:$0xff] }
  0x63   : > { %1654 = vmatprep.subr.mxu0 %v709_v47  ;;  %1825 = vmatprep.subr.mxu1 %v709_v47  ;;  %v681_v41 = vld [vmem:[%s2205_s17 + $0x260] sm:$0xff]  ;;  %v632_v42 = vld [vmem:[%s2205_s17 + $0xd8] sm:$0xff]  ;;  %v682_v44 = vld [vmem:[%s2205_s17 + $0x268] sm:$0xff] }
  0x64   : > { %1655 = vmatpush3.msra.mxu0 %v709_v47  ;;  %1841 = vmatpush3.msra.mxu1 %v709_v47  ;;  %v633_v43 = vld [vmem:[%s2205_s17 + $0xe0] sm:$0xff]  ;;  %v683_v45 = vld [vmem:[%s2205_s17 + $0x270] sm:$0xff]  ;;  %v634_v46 = vld [vmem:[%s2205_s17 + $0xe8] sm:$0xff] }
  0x65   : > { %1656 = vmatprep.subr.mxu0 %v708_v48  ;;  %1826 = vmatprep.subr.mxu1 %v708_v48  ;;  %v635_v47 = vld [vmem:[%s2205_s17 + $0xf0] sm:$0xff] }
  0x66   : > { %1657 = vmatpush3.msra.mxu0 %v708_v48  ;;  %1842 = vmatpush3.msra.mxu1 %v708_v48  ;;  %v684_v48 = vld [vmem:[%s2205_s17 + $0x278] sm:$0xff] }
  0x67   : > { %1658 = vmatprep.subr.mxu0 %v707_v49  ;;  %1827 = vmatprep.subr.mxu1 %v707_v49 }
  0x68   : > { %1659 = vmatpush3.msra.mxu0 %v707_v49  ;;  %1843 = vmatpush3.msra.mxu1 %v707_v49  ;;  %v685_v49 = vld [vmem:[%s2205_s17 + $0x280] sm:$0xff] }
  0x69   : > { %1660 = vmatprep.subr.mxu0 %v706_v50  ;;  %1828 = vmatprep.subr.mxu1 %v706_v50 }
  0x6a   : > { %1661 = vmatpush3.msra.mxu0 %v706_v50  ;;  %1844 = vmatpush3.msra.mxu1 %v706_v50  ;;  %v636_v50 = vld [vmem:[%s2205_s17 + $0xf8] sm:$0xff] }
  0x6b   : > { %1662 = vmatprep.subr.mxu0 %v705_v51  ;;  %1664 = vmatprep.mubr.f32.mxu0 %v605_v52  ;;  %v686_v52 = vld [vmem:[%s2205_s17 + $0x288] sm:$0xff] }
  0x6c   : > { %1663 = vmatpush3.msra.mxu0 %v705_v51  ;;  %1829 = vmatprep.subr.mxu1 %v705_v51 }
  0x6d   : > { %1665 = vmatmul.mubr.f32.vlgmr.msra.gmra.mxu0 %v606_v53  ;;  %1845 = vmatpush3.msra.mxu1 %v705_v51  ;;  %v637_v51 = vld [vmem:[%s2205_s17 + $0x100] sm:$0xff]  ;;  %v687_v53 = vld [vmem:[%s2205_s17 + $0x290] sm:$0xff] }
  0x6e   : > { %1739 = vmatprep.mubr.f32.mxu1 %v655_v54  ;;  %1667 = vmatprep.mubr.f32.mxu0 %v607_v55  ;;  %v638_v54 = vld [vmem:[%s2205_s17 + $0x108] sm:$0xff]  ;;  %v639_v55 = vld [vmem:[%s2205_s17 + $0x110] sm:$0xff] }
  0x6f   : > { %1740 = vmatmul.mubr.f32.vlgmr.msra.gmra.mxu1 %v656_v56  ;;  %v688_v56 = vld [vmem:[%s2205_s17 + $0x298] sm:$0xff] }
  0x70   : > { %1742 = vmatprep.mubr.f32.mxu1 %v657_v57  ;;  %v689_v57 = vld [vmem:[%s2205_s17 + $0x2a0] sm:$0xff] }
  0x71   : > { %1668 = vmatmul.mubr.f32.gmra.mxu0 %v608_v58  ;;  %v640_v58 = vld [vmem:[%s2205_s17 + $0x118] sm:$0xff] }
  0x72   : > { %1670 = vmatprep.mubr.f32.mxu0 %v609_v59  ;;  %v641_v59 = vld [vmem:[%s2205_s17 + $0x120] sm:$0xff] }
  0x73   : > { %1743 = vmatmul.mubr.f32.gmra.mxu1 %v658_v60  ;;  %v690_v60 = vld [vmem:[%s2205_s17 + $0x2a8] sm:$0xff] }
  0x74   : > { %1745 = vmatprep.mubr.f32.mxu1 %v659_v61  ;;  %v691_v61 = vld [vmem:[%s2205_s17 + $0x2b0] sm:$0xff] }
  0x75   : > { %1671 = vmatmul.mubr.f32.gmra.mxu0 %v610_v62  ;;  %v642_v62 = vld [vmem:[%s2205_s17 + $0x128] sm:$0xff] }
  0x76   : > { %1673 = vmatprep.mubr.f32.mxu0 %v611_v63  ;;  %v643_v63 = vld [vmem:[%s2205_s17 + $0x130] sm:$0xff] }
  0x77   : > { %1746 = vmatmul.mubr.f32.gmra.mxu1 %v660_v0  ;;  %v692_v0 = vld [vmem:[%s2205_s17 + $0x2b8] sm:$0xff] }
  0x78   : > { %1748 = vmatprep.mubr.f32.mxu1 %v661_v1  ;;  %v693_v1 = vld [vmem:[%s2205_s17 + $0x2c0] sm:$0xff] }
  0x79   : > { %1674 = vmatmul.mubr.f32.gmra.mxu0 %v612_v2  ;;  %v644_v2 = vld [vmem:[%s2205_s17 + $0x138] sm:$0xff] }
  0x7a   : > { %1676 = vmatprep.mubr.f32.mxu0 %v613_v3  ;;  %v645_v3 = vld [vmem:[%s2205_s17 + $0x140] sm:$0xff] }
  0x7b   : > { %1749 = vmatmul.mubr.f32.gmra.mxu1 %v662_v4  ;;  %v694_v4 = vld [vmem:[%s2205_s17 + $0x2c8] sm:$0xff] }
  0x7c   : > { %1751 = vmatprep.mubr.f32.mxu1 %v663_v5  ;;  %v695_v5 = vld [vmem:[%s2205_s17 + $0x2d0] sm:$0xff] }
  0x7d   : > { %1677 = vmatmul.mubr.f32.gmra.mxu0 %v614_v6  ;;  %v646_v6 = vld [vmem:[%s2205_s17 + $0x148] sm:$0xff] }
  0x7e   : > { %1679 = vmatprep.mubr.f32.mxu0 %v615_v7  ;;  %v647_v7 = vld [vmem:[%s2205_s17 + $0x150] sm:$0xff] }
  0x7f   : > { %1752 = vmatmul.mubr.f32.gmra.mxu1 %v664_v8  ;;  %v696_v8 = vld [vmem:[%s2205_s17 + $0x2d8] sm:$0xff] }
  0x80   : > { %1754 = vmatprep.mubr.f32.mxu1 %v665_v9  ;;  %v697_v9 = vld [vmem:[%s2205_s17 + $0x2e0] sm:$0xff] }
  0x81   : > { %1680 = vmatmul.mubr.f32.gmra.mxu0 %v616_v10  ;;  %v648_v10 = vld [vmem:[%s2205_s17 + $0x158] sm:$0xff] }
  0x82   : > { %1682 = vmatprep.mubr.f32.mxu0 %v617_v11  ;;  %v649_v11 = vld [vmem:[%s2205_s17 + $0x160] sm:$0xff] }
  0x83   : > { %1755 = vmatmul.mubr.f32.gmra.mxu1 %v666_v12  ;;  %v698_v12 = vld [vmem:[%s2205_s17 + $0x2e8] sm:$0xff] }
  0x84   : > { %1757 = vmatprep.mubr.f32.mxu1 %v667_v13  ;;  %v699_v13 = vld [vmem:[%s2205_s17 + $0x2f0] sm:$0xff] }
  0x85   : > { %1683 = vmatmul.mubr.f32.gmra.mxu0 %v618_v14  ;;  %v650_v14 = vld [vmem:[%s2205_s17 + $0x168] sm:$0xff] }
  0x86   : > { %1685 = vmatprep.mubr.f32.mxu0 %v619_v15  ;;  %v651_v15 = vld [vmem:[%s2205_s17 + $0x170] sm:$0xff] }
  0x87   : > { %1758 = vmatmul.mubr.f32.gmra.mxu1 %v668_v16  ;;  %v700_v16 = vld [vmem:[%s2205_s17 + $0x2f8] sm:$0xff] }
  0x88   : > { %1760 = vmatprep.mubr.f32.mxu1 %v669_v17  ;;  %v701_v17 = vld [vmem:[%s2205_s17 + $0x300] sm:$0xff] }
  0x89   : > { %1686 = vmatmul.mubr.f32.gmra.mxu0 %v620_v18  ;;  %v652_v18 = vld [vmem:[%s2205_s17 + $0x178] sm:$0xff] }
  0x8a   : > { %1688 = vmatprep.mubr.f32.mxu0 %v621_v19  ;;  %v653_v19 = vld [vmem:[%s2205_s17 + $0x180] sm:$0xff] }
  0x8b   : > { %1761 = vmatmul.mubr.f32.gmra.mxu1 %v670_v20  ;;  %v702_v20 = vld [vmem:[%s2205_s17 + $0x308] sm:$0xff] }
  0x8c   : > { %1763 = vmatprep.mubr.f32.mxu1 %v671_v21  ;;  %v703_v21 = vld [vmem:[%s2205_s17 + $0x310] sm:$0xff] }
  0x8d   : > { %1689 = vmatmul.mubr.f32.gmra.mxu0 %v622_v22  ;;  %v654_v22 = vld [vmem:[%s2205_s17 + $0x188] sm:$0xff] }
  0x8e   : > { %1691 = vmatprep.mubr.f32.mxu0 %v623_v23  ;;  %v704_v23 = vld [vmem:[%s2205_s17 + $0x318] sm:$0xff] }
  0x8f   : > { %1764 = vmatmul.mubr.f32.gmra.mxu1 %v672_v24 }
  0x90   : > { %1766 = vmatprep.mubr.f32.mxu1 %v673_v25 }
  0x91   : > { %1692 = vmatmul.mubr.f32.gmra.mxu0 %v624_v26 }
  0x92   : > { %1694 = vmatprep.mubr.f32.mxu0 %v625_v27 }
  0x93   : > { %1767 = vmatmul.mubr.f32.gmra.mxu1 %v674_v28 }
  0x94   : > { %1769 = vmatprep.mubr.f32.mxu1 %v675_v29 }
  0x95   : > { %1695 = vmatmul.mubr.f32.gmra.mxu0 %v626_v30 }
  0x96   : > { %1697 = vmatprep.mubr.f32.mxu0 %v627_v31 }
  0x97   : > { %1770 = vmatmul.mubr.f32.gmra.mxu1 %v676_v32 }
  0x98   : > { %1772 = vmatprep.mubr.f32.mxu1 %v677_v33 }
  0x99   : > { %1698 = vmatmul.mubr.f32.gmra.mxu0 %v628_v34 }
  0x9a   : > { %1700 = vmatprep.mubr.f32.mxu0 %v629_v35 }
  0x9b   : > { %1773 = vmatmul.mubr.f32.gmra.mxu1 %v678_v36 }
  0x9c   : > { %1775 = vmatprep.mubr.f32.mxu1 %v679_v37 }
  0x9d   : > { %1701 = vmatmul.mubr.f32.gmra.mxu0 %v630_v38 }
  0x9e   : > { %1703 = vmatprep.mubr.f32.mxu0 %v631_v39 }
  0x9f   : > { %1776 = vmatmul.mubr.f32.gmra.mxu1 %v680_v40 }
  0xa0   : > { %1778 = vmatprep.mubr.f32.mxu1 %v681_v41 }
  0xa1   : > { %1704 = vmatmul.mubr.f32.gmra.mxu0 %v632_v42 }
  0xa2   : > { %1706 = vmatprep.mubr.f32.mxu0 %v633_v43 }
  0xa3   : > { %1779 = vmatmul.mubr.f32.gmra.mxu1 %v682_v44 }
  0xa4   : > { %1781 = vmatprep.mubr.f32.mxu1 %v683_v45 }
  0xa5   : > { %1707 = vmatmul.mubr.f32.gmra.mxu0 %v634_v46 }
  0xa6   : > { %1709 = vmatprep.mubr.f32.mxu0 %v635_v47 }
  0xa7   : > { %1782 = vmatmul.mubr.f32.gmra.mxu1 %v684_v48 }
  0xa8   : > { %1784 = vmatprep.mubr.f32.mxu1 %v685_v49 }
  0xa9   : > { %1710 = vmatmul.mubr.f32.gmra.mxu0 %v636_v50 }
  0xaa   : > { %1712 = vmatprep.mubr.f32.mxu0 %v637_v51 }
  0xab   : > { %1785 = vmatmul.mubr.f32.gmra.mxu1 %v686_v52 }
  0xac   : > { %1787 = vmatprep.mubr.f32.mxu1 %v687_v53 }
  0xad   : > { %1713 = vmatmul.mubr.f32.gmra.mxu0 %v638_v54 }
  0xae   : > { %1715 = vmatprep.mubr.f32.mxu0 %v639_v55 }
  0xaf   : > { %1788 = vmatmul.mubr.f32.gmra.mxu1 %v688_v56 }
  0xb0   : > { %1790 = vmatprep.mubr.f32.mxu1 %v689_v57 }
  0xb1   : > { %1716 = vmatmul.mubr.f32.gmra.mxu0 %v640_v58 }
  0xb2   : > { %1718 = vmatprep.mubr.f32.mxu0 %v641_v59 }
  0xb3   : > { %1791 = vmatmul.mubr.f32.gmra.mxu1 %v690_v60 }
  0xb4   : > { %1793 = vmatprep.mubr.f32.mxu1 %v691_v61 }
  0xb5   : > { %1719 = vmatmul.mubr.f32.gmra.mxu0 %v642_v62 }
  0xb6   : > { %1721 = vmatprep.mubr.f32.mxu0 %v643_v63 }
  0xb7   : > { %1794 = vmatmul.mubr.f32.gmra.mxu1 %v692_v0 }
  0xb8   : > { %1796 = vmatprep.mubr.f32.mxu1 %v693_v1 }
  0xb9   : > { %1722 = vmatmul.mubr.f32.gmra.mxu0 %v644_v2 }
  0xba   : > { %1724 = vmatprep.mubr.f32.mxu0 %v645_v3 }
  0xbb   : > { %1797 = vmatmul.mubr.f32.gmra.mxu1 %v694_v4 }
  0xbc   : > { %1799 = vmatprep.mubr.f32.mxu1 %v695_v5 }
  0xbd   : > { %1725 = vmatmul.mubr.f32.gmra.mxu0 %v646_v6 }
  0xbe   : > { %1727 = vmatprep.mubr.f32.mxu0 %v647_v7 }
  0xbf   : > { %1800 = vmatmul.mubr.f32.gmra.mxu1 %v696_v8 }
  0xc0   : > { %1802 = vmatprep.mubr.f32.mxu1 %v697_v9 }
  0xc1   : > { %1728 = vmatmul.mubr.f32.gmra.mxu0 %v648_v10 }
  0xc2   : > { %1730 = vmatprep.mubr.f32.mxu0 %v649_v11 }
  0xc3   : > { %1803 = vmatmul.mubr.f32.gmra.mxu1 %v698_v12 }
  0xc4   : > { %1805 = vmatprep.mubr.f32.mxu1 %v699_v13  ;;  %v2402_v13 = vld [vmem:[%s2519_s2] ss:$0 sm:$0xff] }
  0xc5   : > { %1731 = vmatmul.mubr.f32.gmra.mxu0 %v650_v14 }
  0xc6   : > { %1733 = vmatprep.mubr.f32.mxu0 %v651_v15 }
  0xc7   : > { %1806 = vmatmul.mubr.f32.gmra.mxu1 %v700_v16 }
  0xc8   : > { %1808 = vmatprep.mubr.f32.mxu1 %v701_v17 }
  0xc9   : > { %1734 = vmatmul.mubr.f32.gmra.mxu0 %v652_v18 }
  0xca   : > { %1736 = vmatprep.mubr.f32.mxu0 %v653_v19 }
  0xcb   : > { %1809 = vmatmul.mubr.f32.gmra.mxu1 %v702_v20 }
  0xcc   : > { %1811 = vmatprep.mubr.f32.mxu1 %v703_v21 }
  0xcd   : > { %1737 = vmatmul.mubr.f32.gmra.mxu0 %v654_v22 }
  0xcf   : > { %1812 = vmatmul.mubr.f32.gmra.mxu1 %v704_v23 }
 0x12d   : > { %v2307_v24 = vpop.f32.mrf.mxu0 }
 0x12f   : > { %v787_v25 = vpop.f32.mrf.mxu0  ;;  %v2309_v26 = vpop.f32.mrf.mxu1 }
 0x131   : > { %v2311_v27 = vpop.f32.mrf.mxu0  ;;  %v1037_v28 = vpop.f32.mrf.mxu1 }
 0x133   : > { %v797_v29 = vpop.f32.mrf.mxu0  ;;  %v2313_v30 = vpop.f32.mrf.mxu1 }
 0x135   : > { %v2315_v31 = vpop.f32.mrf.mxu0  ;;  %v1047_v32 = vpop.f32.mrf.mxu1 }
 0x137   : > { %v2317_v33 = vpop.f32.mrf.mxu0  ;;  %v2319_v34 = vpop.f32.mrf.mxu1 }
 0x139   : > { %v2321_v35 = vpop.f32.mrf.mxu0  ;;  %v2323_v36 = vpop.f32.mrf.mxu1 }
 0x13b   : > { %v2325_v37 = vpop.f32.mrf.mxu0  ;;  %v2327_v38 = vpop.f32.mrf.mxu1 }
 0x13d   : > { %v2329_v39 = vpop.f32.mrf.mxu0  ;;  %v2331_v40 = vpop.f32.mrf.mxu1 }
 0x13f   : > { %v2333_v41 = vpop.f32.mrf.mxu0  ;;  %v2335_v42 = vpop.f32.mrf.mxu1 }
 0x141   : > { %v2337_v43 = vpop.f32.mrf.mxu0  ;;  %v2339_v44 = vpop.f32.mrf.mxu1 }
 0x143   : > { %v2341_v45 = vpop.f32.mrf.mxu0  ;;  %v2343_v46 = vpop.f32.mrf.mxu1 }
 0x145   : > { %v2345_v47 = vpop.f32.mrf.mxu0  ;;  %v2347_v48 = vpop.f32.mrf.mxu1 }
 0x147   : > { %v2349_v49 = vpop.f32.mrf.mxu0  ;;  %v2351_v50 = vpop.f32.mrf.mxu1 }
 0x149   : > { %v2353_v51 = vpop.f32.mrf.mxu0  ;;  %v2355_v52 = vpop.f32.mrf.mxu1 }
 0x14b   : > { %v2357_v53 = vpop.f32.mrf.mxu0  ;;  %v2359_v54 = vpop.f32.mrf.mxu1 }
 0x14d   : > { %v2361_v55 = vpop.f32.mrf.mxu0  ;;  %v2363_v56 = vpop.f32.mrf.mxu1 }
 0x14f   : > { %v2365_v57 = vpop.f32.mrf.mxu0  ;;  %v2367_v58 = vpop.f32.mrf.mxu1 }
 0x151   : > { %v2369_v59 = vpop.f32.mrf.mxu0  ;;  %v2371_v60 = vpop.f32.mrf.mxu1 }
 0x153   : > { %v2373_v61 = vpop.f32.mrf.mxu0  ;;  %v2375_v62 = vpop.f32.mrf.mxu1 }
 0x155   : > { %v2377_v63 = vpop.f32.mrf.mxu0  ;;  %v2379_v0 = vpop.f32.mrf.mxu1 }
 0x157   : > { %v2383_v1 = vpop.f32.mrf.mxu0  ;;  %v2385_v2 = vpop.f32.mrf.mxu1 }
 0x159   : > { %v2387_v3 = vpop.f32.mrf.mxu0  ;;  %v2389_v4 = vpop.f32.mrf.mxu1 }
 0x15b   : > { %v2391_v5 = vpop.f32.mrf.mxu0  ;;  %v2393_v6 = vpop.f32.mrf.mxu1 }
 0x15d   : > { %v1702_v7 = vpop.f32.mrf.mxu0  ;;  %v2395_v8 = vpop.f32.mrf.mxu1 }
 0x15e   : > { %v1286_v9 = vmax.f32 %v787_v25, %v1702_v7 }
 0x15f   : > { %v2397_v10 = vpop.f32.mrf.mxu0  ;;  %v1777_v11 = vpop.f32.mrf.mxu1 }
 0x160   : > { %v1287_v12 = vmax.f32 %v1286_v9, %v1037_v28 }
 0x161   : > { %v1705_v14 = vpop.f32.mrf.mxu0  ;;  %v2404_v15 = vpop.f32.mrf.mxu1 }
 0x162   : > { %v1288_v16 = vmax.f32 %v1287_v12, %v1777_v11  ;;  %v1292_v17 = vmax.f32 %v797_v29, %v1705_v14 }
 0x163   : > { %v917_v18 = vpop.f32.mrf.mxu0  ;;  %v1780_v19 = vpop.f32.mrf.mxu1 }
 0x164   : > { %v1368_v20 = vadd.f32 %v2402_v13, %v1288_v16  ;;  %v1289_v21 = vmax.f32 %v2307_v24, %v917_v18  ;;  %v1293_v22 = vmax.f32 %v1292_v17, %v1047_v32 }
 0x165   : > { %v1708_v23 = vpop.f32.mrf.mxu0  ;;  %v1167_v25 = vpop.f32.mrf.mxu1 }
 0x166   : > { %v1393_v28 = vmax.f32 %v1368_v20, 0.0  ;;  %v1294_v7 = vmax.f32 %v1293_v22, %v1780_v19  ;;  %v1298_v9 = vmax.f32 %v2317_v33, %v1708_v23  ;;  %v1290_v29 = vmax.f32 %v1289_v21, %v2309_v26 }
 0x167   : > { %v927_v11 = vpop.f32.mrf.mxu0  ;;  %v1783_v12 = vpop.f32.mrf.mxu1 }
 0x168   : > { %1418 = vst [vmem:[%s2411_s23] sm:$0xff] %v1393_v28  ;;  %v1370_v24 = vadd.f32 %v2402_v13, %v1294_v7  ;;  %v1291_v32 = vmax.f32 %v1290_v29, %v1167_v25  ;;  %v1295_v14 = vmax.f32 %v2311_v27, %v927_v11  ;;  %v1299_v16 = vmax.f32 %v1298_v9, %v2323_v36 }
 0x169   : > { %v1711_v17 = vpop.f32.mrf.mxu0  ;;  %v1177_v18 = vpop.f32.mrf.mxu1 }
 0x16a   : > { %v1395_v20 = vmax.f32 %v1370_v24, 0.0  ;;  %v1369_v19 = vadd.f32 %v2402_v13, %v1291_v32  ;;  %v1300_v33 = vmax.f32 %v1299_v16, %v1783_v12  ;;  %v1304_v26 = vmax.f32 %v2325_v37, %v1711_v17 }
 0x16b   : > { %v1296_v21 = vmax.f32 %v1295_v14, %v2313_v30  ;;  %v937_v22 = vpop.f32.mrf.mxu0  ;;  %v1786_v23 = vpop.f32.mrf.mxu1 }
 0x16c   : > { %1420 = vst [vmem:[%s2411_s23 + $0x10] sm:$0xff] %v1395_v20  ;;  %v1394_v25 = vmax.f32 %v1369_v19, 0.0  ;;  %v1372_v27 = vadd.f32 %v2402_v13, %v1300_v33  ;;  %v1301_v36 = vmax.f32 %v2315_v31, %v937_v22  ;;  %v1305_v28 = vmax.f32 %v1304_v26, %v2331_v40 }
 0x16d   : > { %v1297_v7 = vmax.f32 %v1296_v21, %v1177_v18  ;;  %v1714_v9 = vpop.f32.mrf.mxu0  ;;  %v1187_v29 = vpop.f32.mrf.mxu1 }
 0x16e   : > { %1419 = vst [vmem:[%s2411_s23 + $0x8] sm:$0xff] %v1394_v25  ;;  %v1397_v11 = vmax.f32 %v1372_v27, 0.0  ;;  %v1306_v12 = vmax.f32 %v1305_v28, %v1786_v23  ;;  %v1310_v37 = vmax.f32 %v2333_v41, %v1714_v9  ;;  %v1302_v30 = vmax.f32 %v1301_v36, %v2319_v34 }
 0x16f   : > { %v1371_v24 = vadd.f32 %v2402_v13, %v1297_v7  ;;  %v947_v32 = vpop.f32.mrf.mxu0  ;;  %v1789_v14 = vpop.f32.mrf.mxu1 }
 0x170   : > { %1422 = vst [vmem:[%s2411_s23 + $0x20] sm:$0xff] %v1397_v11  ;;  %v1374_v31 = vadd.f32 %v2402_v13, %v1306_v12  ;;  %v1303_v40 = vmax.f32 %v1302_v30, %v1187_v29  ;;  %v1307_v16 = vmax.f32 %v2321_v35, %v947_v32  ;;  %v1311_v17 = vmax.f32 %v1310_v37, %v2339_v44 }
 0x171   : > { %v1396_v18 = vmax.f32 %v1371_v24, 0.0  ;;  %v1717_v20 = vpop.f32.mrf.mxu0  ;;  %v1197_v19 = vpop.f32.mrf.mxu1 }
 0x172   : > { %v1399_v41 = vmax.f32 %v1374_v31, 0.0  ;;  %v1373_v34 = vadd.f32 %v2402_v13, %v1303_v40  ;;  %v1312_v33 = vmax.f32 %v1311_v17, %v1789_v14  ;;  %v1316_v26 = vmax.f32 %v2341_v45, %v1717_v20 }
 0x173   : > { %1421 = vst [vmem:[%s2411_s23 + $0x18] sm:$0xff] %v1396_v18  ;;  %v1308_v21 = vmax.f32 %v1307_v16, %v2327_v38  ;;  %v957_v22 = vpop.f32.mrf.mxu0  ;;  %v1792_v23 = vpop.f32.mrf.mxu1 }
 0x174   : > { %1424 = vst [vmem:[%s2411_s23 + $0x30] sm:$0xff] %v1399_v41  ;;  %v1398_v35 = vmax.f32 %v1373_v34, 0.0  ;;  %v1376_v44 = vadd.f32 %v2402_v13, %v1312_v33  ;;  %v1313_v25 = vmax.f32 %v2329_v39, %v957_v22  ;;  %v1317_v27 = vmax.f32 %v1316_v26, %v2347_v48 }
 0x175   : > { %v1309_v36 = vmax.f32 %v1308_v21, %v1197_v19  ;;  %v1720_v28 = vpop.f32.mrf.mxu0  ;;  %v1207_v7 = vpop.f32.mrf.mxu1 }
 0x176   : > { %1423 = vst [vmem:[%s2411_s23 + $0x28] sm:$0xff] %v1398_v35  ;;  %v1401_v9 = vmax.f32 %v1376_v44, 0.0  ;;  %v1318_v45 = vmax.f32 %v1317_v27, %v1792_v23  ;;  %v1322_v29 = vmax.f32 %v2349_v49, %v1720_v28  ;;  %v1314_v38 = vmax.f32 %v1313_v25, %v2335_v42 }
 0x177   : > { %v1375_v11 = vadd.f32 %v2402_v13, %v1309_v36  ;;  %v967_v12 = vpop.f32.mrf.mxu0  ;;  %v1795_v37 = vpop.f32.mrf.mxu1 }
 0x178   : > { %1426 = vst [vmem:[%s2411_s23 + $0x40] sm:$0xff] %v1401_v9  ;;  %v1378_v39 = vadd.f32 %v2402_v13, %v1318_v45  ;;  %v1315_v48 = vmax.f32 %v1314_v38, %v1207_v7  ;;  %v1319_v30 = vmax.f32 %v2337_v43, %v967_v12  ;;  %v1323_v24 = vmax.f32 %v1322_v29, %v2355_v52 }
 0x179   : > { %v1400_v32 = vmax.f32 %v1375_v11, 0.0  ;;  %v1723_v14 = vpop.f32.mrf.mxu0  ;;  %v1217_v31 = vpop.f32.mrf.mxu1 }
 0x17a   : > { %v1403_v49 = vmax.f32 %v1378_v39, 0.0  ;;  %v1377_v42 = vadd.f32 %v2402_v13, %v1315_v48  ;;  %v1324_v40 = vmax.f32 %v1323_v24, %v1795_v37  ;;  %v1328_v16 = vmax.f32 %v2357_v53, %v1723_v14 }
 0x17b   : > { %1425 = vst [vmem:[%s2411_s23 + $0x38] sm:$0xff] %v1400_v32  ;;  %v1320_v17 = vmax.f32 %v1319_v30, %v2343_v46  ;;  %v977_v18 = vpop.f32.mrf.mxu0  ;;  %v1798_v20 = vpop.f32.mrf.mxu1 }
 0x17c   : > { %1428 = vst [vmem:[%s2411_s23 + $0x50] sm:$0xff] %v1403_v49  ;;  %v1402_v43 = vmax.f32 %v1377_v42, 0.0  ;;  %v1380_v52 = vadd.f32 %v2402_v13, %v1324_v40  ;;  %v1325_v19 = vmax.f32 %v2345_v47, %v977_v18  ;;  %v1329_v41 = vmax.f32 %v1328_v16, %v2363_v56 }
 0x17d   : > { %v1321_v34 = vmax.f32 %v1320_v17, %v1217_v31  ;;  %v1726_v33 = vpop.f32.mrf.mxu0  ;;  %v1227_v26 = vpop.f32.mrf.mxu1 }
 0x17e   : > { %1427 = vst [vmem:[%s2411_s23 + $0x48] sm:$0xff] %v1402_v43  ;;  %v1405_v21 = vmax.f32 %v1380_v52, 0.0  ;;  %v1330_v53 = vmax.f32 %v1329_v41, %v1798_v20  ;;  %v1334_v22 = vmax.f32 %v2365_v57, %v1726_v33  ;;  %v1326_v46 = vmax.f32 %v1325_v19, %v2351_v50 }
 0x17f   : > { %v1379_v23 = vadd.f32 %v2402_v13, %v1321_v34  ;;  %v987_v35 = vpop.f32.mrf.mxu0  ;;  %v1801_v44 = vpop.f32.mrf.mxu1 }
 0x180   : > { %1430 = vst [vmem:[%s2411_s23 + $0x60] sm:$0xff] %v1405_v21  ;;  %v1382_v47 = vadd.f32 %v2402_v13, %v1330_v53  ;;  %v1327_v56 = vmax.f32 %v1326_v46, %v1227_v26  ;;  %v1331_v25 = vmax.f32 %v2353_v51, %v987_v35  ;;  %v1335_v27 = vmax.f32 %v1334_v22, %v2371_v60 }
 0x181   : > { %v1404_v36 = vmax.f32 %v1379_v23, 0.0  ;;  %v1729_v28 = vpop.f32.mrf.mxu0  ;;  %v1237_v7 = vpop.f32.mrf.mxu1 }
 0x182   : > { %v1407_v57 = vmax.f32 %v1382_v47, 0.0  ;;  %v1381_v50 = vadd.f32 %v2402_v13, %v1327_v56  ;;  %v1336_v9 = vmax.f32 %v1335_v27, %v1801_v44  ;;  %v1340_v45 = vmax.f32 %v2373_v61, %v1729_v28 }
 0x183   : > { %1429 = vst [vmem:[%s2411_s23 + $0x58] sm:$0xff] %v1404_v36  ;;  %v1332_v29 = vmax.f32 %v1331_v25, %v2359_v54  ;;  %v997_v38 = vpop.f32.mrf.mxu0  ;;  %v1804_v11 = vpop.f32.mrf.mxu1 }
 0x184   : > { %1432 = vst [vmem:[%s2411_s23 + $0x70] sm:$0xff] %v1407_v57  ;;  %v1406_v51 = vmax.f32 %v1381_v50, 0.0  ;;  %v1384_v60 = vadd.f32 %v2402_v13, %v1336_v9  ;;  %v1337_v12 = vmax.f32 %v2361_v55, %v997_v38  ;;  %v1341_v37 = vmax.f32 %v1340_v45, %v2379_v0 }
 0x185   : > { %v1333_v39 = vmax.f32 %v1332_v29, %v1237_v7  ;;  %v1732_v48 = vpop.f32.mrf.mxu0  ;;  %v1247_v30 = vpop.f32.mrf.mxu1 }
 0x186   : > { %1431 = vst [vmem:[%s2411_s23 + $0x68] sm:$0xff] %v1406_v51  ;;  %v1409_v24 = vmax.f32 %v1384_v60, 0.0  ;;  %v1342_v61 = vmax.f32 %v1341_v37, %v1804_v11  ;;  %v1346_v32 = vmax.f32 %v2383_v1, %v1732_v48  ;;  %v1338_v54 = vmax.f32 %v1337_v12, %v2367_v58 }
 0x187   : > { %v1383_v14 = vadd.f32 %v2402_v13, %v1333_v39  ;;  %v1007_v31 = vpop.f32.mrf.mxu0  ;;  %v1807_v49 = vpop.f32.mrf.mxu1 }
 0x188   : > { %1434 = vst [vmem:[%s2411_s23 + $0x80] sm:$0xff] %v1409_v24  ;;  %v1386_v55 = vadd.f32 %v2402_v13, %v1342_v61  ;;  %v1339_v0 = vmax.f32 %v1338_v54, %v1247_v30  ;;  %v1343_v42 = vmax.f32 %v2369_v59, %v1007_v31  ;;  %v1347_v40 = vmax.f32 %v1346_v32, %v2389_v4 }
 0x189   : > { %v1408_v16 = vmax.f32 %v1383_v14, 0.0  ;;  %v1735_v17 = vpop.f32.mrf.mxu0  ;;  %v1257_v18 = vpop.f32.mrf.mxu1 }
 0x18a   : > { %v1411_v1 = vmax.f32 %v1386_v55, 0.0  ;;  %v1385_v58 = vadd.f32 %v2402_v13, %v1339_v0  ;;  %v1348_v20 = vmax.f32 %v1347_v40, %v1807_v49  ;;  %v1352_v43 = vmax.f32 %v2391_v5, %v1735_v17 }
 0x18b   : > { %1433 = vst [vmem:[%s2411_s23 + $0x78] sm:$0xff] %v1408_v16  ;;  %v1344_v52 = vmax.f32 %v1343_v42, %v2375_v62  ;;  %v1017_v19 = vpop.f32.mrf.mxu0  ;;  %v1810_v41 = vpop.f32.mrf.mxu1 }
 0x18c   : > { %1436 = vst [vmem:[%s2411_s23 + $0x90] sm:$0xff] %v1411_v1  ;;  %v1410_v59 = vmax.f32 %v1385_v58, 0.0  ;;  %v1388_v4 = vadd.f32 %v2402_v13, %v1348_v20  ;;  %v1349_v34 = vmax.f32 %v2377_v63, %v1017_v19  ;;  %v1353_v33 = vmax.f32 %v1352_v43, %v2395_v8 }
 0x18d   : > { %v1345_v26 = vmax.f32 %v1344_v52, %v1257_v18  ;;  %v1738_v21 = vpop.f32.mrf.mxu0  ;;  %v1267_v53 = vpop.f32.mrf.mxu1 }
 0x18e   : > { %1435 = vst [vmem:[%s2411_s23 + $0x88] sm:$0xff] %v1410_v59  ;;  %v1413_v22 = vmax.f32 %v1388_v4, 0.0  ;;  %v1354_v5 = vmax.f32 %v1353_v33, %v1810_v41  ;;  %v1358_v62 = vmax.f32 %v2397_v10, %v1738_v21  ;;  %v1350_v46 = vmax.f32 %v1349_v34, %v2385_v2 }
 0x18f   : > { %v1387_v23 = vadd.f32 %v2402_v13, %v1345_v26  ;;  %v1027_v35 = vpop.f32.mrf.mxu0  ;;  %v1813_v44 = vpop.f32.mrf.mxu1 }
 0x190   : > { %1438 = vst [vmem:[%s2411_s23 + $0xa0] sm:$0xff] %v1413_v22  ;;  %v1390_v63 = vadd.f32 %v2402_v13, %v1354_v5  ;;  %v1351_v8 = vmax.f32 %v1350_v46, %v1267_v53  ;;  %v1355_v47 = vmax.f32 %v2387_v3, %v1027_v35  ;;  %v1359_v56 = vmax.f32 %v1358_v62, %v2404_v15 }
 0x191   : > { %v1412_v25 = vmax.f32 %v1387_v23, 0.0  ;;  %v1277_v28 = vpop.f32.mrf.mxu1 }
 0x192   : > { %v1415_v10 = vmax.f32 %v1390_v63, 0.0  ;;  %v1389_v2 = vadd.f32 %v2402_v13, %v1351_v8  ;;  %v1360_v27 = vmax.f32 %v1359_v56, %v1813_v44  ;;  %v1356_v36 = vmax.f32 %v1355_v47, %v2393_v6 }
 0x193   : > { %1437 = vst [vmem:[%s2411_s23 + $0x98] sm:$0xff] %v1412_v25 }
 0x194   : > { %1440 = vst [vmem:[%s2411_s23 + $0xb0] sm:$0xff] %v1415_v10  ;;  %v1414_v7 = vmax.f32 %v1389_v2, 0.0  ;;  %v1392_v57 = vadd.f32 %v2402_v13, %v1360_v27  ;;  %v1357_v50 = vmax.f32 %v1356_v36, %v1277_v28 }
 0x196   : > { %1439 = vst [vmem:[%s2411_s23 + $0xa8] sm:$0xff] %v1414_v7  ;;  %v1417_v3 = vmax.f32 %v1392_v57, 0.0  ;;  %v1391_v9 = vadd.f32 %v2402_v13, %v1357_v50 }
 0x198   : > { %1442 = vst [vmem:[%s2411_s23 + $0xc0] sm:$0xff] %v1417_v3  ;;  %v1416_v15 = vmax.f32 %v1391_v9, 0.0 }
 0x19a   : > { %1441 = vst [vmem:[%s2411_s23 + $0xb8] sm:$0xff] %v1416_v15 }
 0x19b PF: > { %p10_p9 = scmp.ge.s32.totalorder %s1933_s16, 4   ;;  %s2521_s12 = smov %s1890_s13 }
 0x19c   : > { %s2522_s13 = smov %s1942_s19  ;;  %s2523_s14 = smov %s1933_s16 }
 0x19d   :  { %12 = sbr.rel (!%p10_p9) target bundleno = 2 (0x2), region = 105 }

// kernel: net_forward.4
= control target key start
LH: loop header
LB: loop body
LE: loop exit
PB: predicated region body
PF: predicated region fallthrough
CT: control target
= control target key end

     0   :  { %s755_s12 = smov 0   ;;  %s757_s13 = smov 0   ;;  %s1008_s0 = inlined_call_operand.vmem [shape: f32[4,64,256], index: 0, kind: input, shape index: {}]   ;;  %s1009_s1 = inlined_call_operand.vmem [shape: f32[256,128], index: 1, kind: input, shape index: {}]   ;;  %s1010_s2 = inlined_call_operand.vmem [shape: f32[1,128], index: 2, kind: input, shape index: {}]   ;;  %s1011_s3 = inlined_call_operand.vmem [shape: f32[64,128], index: 3, kind: output, shape index: {}]  }
   0x1   :  { %s759_s14 = smov 0  }
   0x2 LB: > { %s558_s15 = sadd.s32 4294967295, %s733_s14   ;;  %s772_s16 = sadd.s32 1, %s733_s14   ;;  %s733_s14 = sphi %s759_s14, %s1014_s14   ;;  %s729_s13 = sphi %s757_s13, %s1013_s13   ;;  %s725_s12 = sphi %s755_s12, %s1012_s12  }
   0x3   : > { %s17_s17 = ssub.s32 %s733_s14, %s772_s16  ;;  %s20_s18 = sadd.s32 1, %s729_s13 }
   0x4   : > { %p18_p0 = scmp.eq.s32.totalorder %s17_s17, 0  ;;  %p27_p1 = scmp.ne.s32.totalorder %s729_s13, %s725_s12 }
   0x5   : > { %p28_p2 = scmp.eq.s32.totalorder %s733_s14, 0  ;;  %p561_p4 = scmp.ge.s32.totalorder %s733_s14, 2 }
   0x6   : > { %s781_s19 = scalar_select %p18_p0, %s729_s13, %s20_s18  }
   0x7   : > { %p29_p3 = por %p28_p2, %p27_p1  ;;  %127 = sbr.rel (%p561_p4) target bundleno = 32 (0x20), region = 24 }
   0xc   : > { %130 = sbr.rel (!%p29_p3) target bundleno = 32 (0x20), region = 28  ;;  %s132_s20 = sand.u32 (%p29_p3), 1, %s729_s13  }
   0xd   : > { %s574_s21 = sshll.u32 (%p29_p3), %s733_s14, 6  ;;  %s562_s22 = sshll.u32 (%p29_p3), %s132_s20, 8 }
   0xe   : > { %s789_s25 = scalar_lea.vmem (%p29_p3), %s1008_s0, %s574_s21  ;;  %s794_s26 = scalar_lea.vmem (%p29_p3), [#allocation2], %s562_s22 }
   0xf   : > { %v151_v0 = vld [vmem:[%s789_s25] sm:$0xff] (%p29_p3)  ;;  %v153_v1 = vld [vmem:[%s789_s25 + $0x8] sm:$0xff] (%p29_p3)  ;;  %v155_v2 = vld [vmem:[%s789_s25 + $0x10] sm:$0xff] (%p29_p3) }
  0x10   : > { %152 = vst [vmem:[%s794_s26] sm:$0xff] (%p29_p3), %v151_v0  ;;  %154 = vst [vmem:[%s794_s26 + $0x8] sm:$0xff] (%p29_p3), %v153_v1  ;;  %v157_v3 = vld [vmem:[%s789_s25 + $0x18] sm:$0xff] (%p29_p3)  ;;  %v159_v4 = vld [vmem:[%s789_s25 + $0x20] sm:$0xff] (%p29_p3) }
  0x11   : > { %156 = vst [vmem:[%s794_s26 + $0x10] sm:$0xff] %v155_v2  ;;  %v161_v5 = vld [vmem:[%s789_s25 + $0x28] sm:$0xff]  ;;  %158 = vst [vmem:[%s794_s26 + $0x18] sm:$0xff] %v157_v3  ;;  %v163_v6 = vld [vmem:[%s789_s25 + $0x30] sm:$0xff] }
  0x12   : > { %160 = vst [vmem:[%s794_s26 + $0x20] sm:$0xff] %v159_v4  ;;  %162 = vst [vmem:[%s794_s26 + $0x28] sm:$0xff] %v161_v5  ;;  %v165_v7 = vld [vmem:[%s789_s25 + $0x38] sm:$0xff]  ;;  %v167_v8 = vld [vmem:[%s789_s25 + $0x80] sm:$0xff] }
  0x13   : > { %164 = vst [vmem:[%s794_s26 + $0x30] sm:$0xff] %v163_v6  ;;  %166 = vst [vmem:[%s794_s26 + $0x38] sm:$0xff] %v165_v7  ;;  %v169_v9 = vld [vmem:[%s789_s25 + $0x88] sm:$0xff]  ;;  %v171_v10 = vld [vmem:[%s789_s25 + $0x90] sm:$0xff] }
  0x14   : > { %168 = vst [vmem:[%s794_s26 + $0x40] sm:$0xff] %v167_v8  ;;  %v173_v11 = vld [vmem:[%s789_s25 + $0x98] sm:$0xff]  ;;  %170 = vst [vmem:[%s794_s26 + $0x48] sm:$0xff] %v169_v9  ;;  %v175_v12 = vld [vmem:[%s789_s25 + $0xa0] sm:$0xff] }
  0x15   : > { %172 = vst [vmem:[%s794_s26 + $0x50] sm:$0xff] %v171_v10  ;;  %174 = vst [vmem:[%s794_s26 + $0x58] sm:$0xff] %v173_v11  ;;  %v177_v13 = vld [vmem:[%s789_s25 + $0xa8] sm:$0xff]  ;;  %v179_v14 = vld [vmem:[%s789_s25 + $0xb0] sm:$0xff] }
  0x16   : > { %176 = vst [vmem:[%s794_s26 + $0x60] sm:$0xff] %v175_v12  ;;  %178 = vst [vmem:[%s794_s26 + $0x68] sm:$0xff] %v177_v13  ;;  %v181_v15 = vld [vmem:[%s789_s25 + $0xb8] sm:$0xff]  ;;  %v183_v16 = vld [vmem:[%s789_s25 + $0x100] sm:$0xff] }
  0x17   : > { %180 = vst [vmem:[%s794_s26 + $0x70] sm:$0xff] %v179_v14  ;;  %v185_v17 = vld [vmem:[%s789_s25 + $0x108] sm:$0xff]  ;;  %182 = vst [vmem:[%s794_s26 + $0x78] sm:$0xff] %v181_v15  ;;  %v187_v18 = vld [vmem:[%s789_s25 + $0x110] sm:$0xff] }
  0x18   : > { %184 = vst [vmem:[%s794_s26 + $0x80] sm:$0xff] %v183_v16  ;;  %186 = vst [vmem:[%s794_s26 + $0x88] sm:$0xff] %v185_v17  ;;  %v189_v19 = vld [vmem:[%s789_s25 + $0x118] sm:$0xff]  ;;  %v191_v20 = vld [vmem:[%s789_s25 + $0x120] sm:$0xff] }
  0x19   : > { %188 = vst [vmem:[%s794_s26 + $0x90] sm:$0xff] %v187_v18  ;;  %190 = vst [vmem:[%s794_s26 + $0x98] sm:$0xff] %v189_v19  ;;  %v193_v21 = vld [vmem:[%s789_s25 + $0x128] sm:$0xff]  ;;  %v195_v22 = vld [vmem:[%s789_s25 + $0x130] sm:$0xff] }
  0x1a   : > { %192 = vst [vmem:[%s794_s26 + $0xa0] sm:$0xff] %v191_v20  ;;  %v197_v23 = vld [vmem:[%s789_s25 + $0x138] sm:$0xff]  ;;  %194 = vst [vmem:[%s794_s26 + $0xa8] sm:$0xff] %v193_v21  ;;  %v199_v24 = vld [vmem:[%s789_s25 + $0x180] sm:$0xff] }
  0x1b   : > { %196 = vst [vmem:[%s794_s26 + $0xb0] sm:$0xff] %v195_v22  ;;  %198 = vst [vmem:[%s794_s26 + $0xb8] sm:$0xff] %v197_v23  ;;  %v201_v25 = vld [vmem:[%s789_s25 + $0x188] sm:$0xff]  ;;  %v203_v26 = vld [vmem:[%s789_s25 + $0x190] sm:$0xff] }
  0x1c   : > { %200 = vst [vmem:[%s794_s26 + $0xc0] sm:$0xff] %v199_v24  ;;  %202 = vst [vmem:[%s794_s26 + $0xc8] sm:$0xff] %v201_v25  ;;  %v205_v27 = vld [vmem:[%s789_s25 + $0x198] sm:$0xff]  ;;  %v207_v28 = vld [vmem:[%s789_s25 + $0x1a0] sm:$0xff] }
  0x1d   : > { %204 = vst [vmem:[%s794_s26 + $0xd0] sm:$0xff] %v203_v26  ;;  %v209_v29 = vld [vmem:[%s789_s25 + $0x1a8] sm:$0xff]  ;;  %206 = vst [vmem:[%s794_s26 + $0xd8] sm:$0xff] %v205_v27  ;;  %v211_v30 = vld [vmem:[%s789_s25 + $0x1b0] sm:$0xff] }
  0x1e   : > { %208 = vst [vmem:[%s794_s26 + $0xe0] sm:$0xff] %v207_v28  ;;  %210 = vst [vmem:[%s794_s26 + $0xe8] sm:$0xff] %v209_v29  ;;  %v213_v31 = vld [vmem:[%s789_s25 + $0x1b8] sm:$0xff] }
  0x1f   : > { %212 = vst [vmem:[%s794_s26 + $0xf0] sm:$0xff] %v211_v30  ;;  %214 = vst [vmem:[%s794_s26 + $0xf8] sm:$0xff] %v213_v31 }
  0x20 PF: > { %p566_p5 = scmp.ge.s32.totalorder %s733_s14, 1  ;;  %p219_p6 = scmp.lt.s32.totalorder %s733_s14, 3 }
  0x22   : > { %p220_p7 = pnand %p566_p5, %p219_p6 }
  0x23   : > { %s226_s29 = sand.u32 (!%p220_p7), 1, %s725_s12   ;;  %s568_s30 = sshll.u32 (!%p220_p7), %s558_s15, 2 }
  0x24   : > { %223 = sbr.rel (%p220_p7) target bundleno = 310 (0x136), region = 51  ;;  %s567_s9 = sshll.u32 (!%p220_p7), %s226_s29, 8 }
  0x25   : > { %s953_s27 = scalar_lea.vmem (!%p220_p7), [#allocation2], %s567_s9  ;;  %p251_p8 = scmp.lt.s32.totalorder (!%p220_p7), %s568_s30, 7 }
  0x29   : > { %v319_v32 = vld [vmem:[%s1009_s1 + $0xf8] sm:$0xff]  ;;  %v318_v34 = vld [vmem:[%s1009_s1 + $0xf0] sm:$0xff]  ;;  %v317_v36 = vld [vmem:[%s1009_s1 + $0xe8] sm:$0xff]  ;;  %s1016_s30 = smov (!%p251_p8, %s568_s30), 7 }
  0x2a   : > { %v303_v33 = vld [vmem:[%s1009_s1 + $0x78] sm:$0xff]  ;;  %575 = vmatprep.subr.mxu0 %v319_v32  ;;  %655 = vmatprep.subr.mxu1 %v319_v32  ;;  %v302_v35 = vld [vmem:[%s1009_s1 + $0x70] sm:$0xff]  ;;  %v301_v37 = vld [vmem:[%s1009_s1 + $0x68] sm:$0xff]  ;;  %s569_s4 = sshll.u32 %s1016_s30, 3 }
  0x2b   : > { %576 = vmatpush3.msra.mxu0 %v303_v33  ;;  %671 = vmatpush3.msra.mxu1 %v303_v33  ;;  %v316_v38 = vld [vmem:[%s1009_s1 + $0xe0] sm:$0xff]  ;;  %v315_v40 = vld [vmem:[%s1009_s1 + $0xd8] sm:$0xff]  ;;  %v314_v42 = vld [vmem:[%s1009_s1 + $0xd0] sm:$0xff]  ;;  %s254_s7 = scalar_lea.vmem %s1011_s3, %s569_s4 }
  0x2c   : > { %577 = vmatprep.subr.mxu0 %v318_v34  ;;  %656 = vmatprep.subr.mxu1 %v318_v34  ;;  %v300_v39 = vld [vmem:[%s1009_s1 + $0x60] sm:$0xff]  ;;  %v299_v41 = vld [vmem:[%s1009_s1 + $0x58] sm:$0xff]  ;;  %v298_v43 = vld [vmem:[%s1009_s1 + $0x50] sm:$0xff] }
  0x2d   : > { %578 = vmatpush3.msra.mxu0 %v302_v35  ;;  %672 = vmatpush3.msra.mxu1 %v302_v35  ;;  %v313_v44 = vld [vmem:[%s1009_s1 + $0xc8] sm:$0xff]  ;;  %v312_v46 = vld [vmem:[%s1009_s1 + $0xc0] sm:$0xff]  ;;  %v311_v48 = vld [vmem:[%s1009_s1 + $0xb8] sm:$0xff] }
  0x2e   : > { %579 = vmatprep.subr.mxu0 %v317_v36  ;;  %657 = vmatprep.subr.mxu1 %v317_v36  ;;  %v297_v45 = vld [vmem:[%s1009_s1 + $0x48] sm:$0xff]  ;;  %v296_v47 = vld [vmem:[%s1009_s1 + $0x40] sm:$0xff]  ;;  %v295_v49 = vld [vmem:[%s1009_s1 + $0x38] sm:$0xff] }
  0x2f   : > { %580 = vmatpush3.msra.mxu0 %v301_v37  ;;  %673 = vmatpush3.msra.mxu1 %v301_v37  ;;  %v310_v50 = vld [vmem:[%s1009_s1 + $0xb0] sm:$0xff]  ;;  %v309_v52 = vld [vmem:[%s1009_s1 + $0xa8] sm:$0xff]  ;;  %v308_v54 = vld [vmem:[%s1009_s1 + $0xa0] sm:$0xff] }
  0x30   : > { %581 = vmatprep.subr.mxu0 %v316_v38  ;;  %658 = vmatprep.subr.mxu1 %v316_v38  ;;  %v294_v51 = vld [vmem:[%s1009_s1 + $0x30] sm:$0xff]  ;;  %v293_v53 = vld [vmem:[%s1009_s1 + $0x28] sm:$0xff]  ;;  %v292_v55 = vld [vmem:[%s1009_s1 + $0x20] sm:$0xff] }
  0x31   : > { %582 = vmatpush3.msra.mxu0 %v300_v39  ;;  %674 = vmatpush3.msra.mxu1 %v300_v39  ;;  %v307_v56 = vld [vmem:[%s1009_s1 + $0x98] sm:$0xff]  ;;  %v306_v58 = vld [vmem:[%s1009_s1 + $0x90] sm:$0xff]  ;;  %v305_v60 = vld [vmem:[%s1009_s1 + $0x88] sm:$0xff] }
  0x32   : > { %583 = vmatprep.subr.mxu0 %v315_v40  ;;  %659 = vmatprep.subr.mxu1 %v315_v40  ;;  %v291_v57 = vld [vmem:[%s1009_s1 + $0x18] sm:$0xff]  ;;  %v290_v59 = vld [vmem:[%s1009_s1 + $0x10] sm:$0xff]  ;;  %v289_v61 = vld [vmem:[%s1009_s1 + $0x8] sm:$0xff] }
  0x33   : > { %584 = vmatpush3.msra.mxu0 %v299_v41  ;;  %675 = vmatpush3.msra.mxu1 %v299_v41  ;;  %v304_v62 = vld [vmem:[%s1009_s1 + $0x80] sm:$0xff]  ;;  %v257_v63 = vld [vmem:[%s953_s27 + $0x8] sm:$0xff]  ;;  %v259_v3 = vld [vmem:[%s953_s27 + $0x18] sm:$0xff] }
  0x34   : > { %585 = vmatprep.subr.mxu0 %v314_v42  ;;  %660 = vmatprep.subr.mxu1 %v314_v42  ;;  %v288_v0 = vld [vmem:[%s1009_s1] sm:$0xff]  ;;  %v273_v2 = vld [vmem:[%s953_s27 + $0x88] sm:$0xff]  ;;  %v275_v5 = vld [vmem:[%s953_s27 + $0x98] sm:$0xff] }
  0x35   : > { %586 = vmatpush3.msra.mxu0 %v298_v43  ;;  %676 = vmatpush3.msra.mxu1 %v298_v43  ;;  %v256_v1 = vld [vmem:[%s953_s27] sm:$0xff]  ;;  %v258_v6 = vld [vmem:[%s953_s27 + $0x10] sm:$0xff]  ;;  %v261_v7 = vld [vmem:[%s953_s27 + $0x28] sm:$0xff] }
  0x36   : > { %587 = vmatprep.subr.mxu0 %v313_v44  ;;  %661 = vmatprep.subr.mxu1 %v313_v44  ;;  %v272_v4 = vld [vmem:[%s953_s27 + $0x80] sm:$0xff]  ;;  %v274_v8 = vld [vmem:[%s953_s27 + $0x90] sm:$0xff]  ;;  %v277_v9 = vld [vmem:[%s953_s27 + $0xa8] sm:$0xff] }
  0x37   : > { %588 = vmatpush3.msra.mxu0 %v297_v45  ;;  %677 = vmatpush3.msra.mxu1 %v297_v45  ;;  %v260_v10 = vld [vmem:[%s953_s27 + $0x20] sm:$0xff]  ;;  %v263_v11 = vld [vmem:[%s953_s27 + $0x38] sm:$0xff]  ;;  %v262_v14 = vld [vmem:[%s953_s27 + $0x30] sm:$0xff] }
  0x38   : > { %589 = vmatprep.subr.mxu0 %v312_v46  ;;  %662 = vmatprep.subr.mxu1 %v312_v46  ;;  %v276_v12 = vld [vmem:[%s953_s27 + $0xa0] sm:$0xff]  ;;  %v279_v13 = vld [vmem:[%s953_s27 + $0xb8] sm:$0xff]  ;;  %v265_v15 = vld [vmem:[%s953_s27 + $0x48] sm:$0xff] }
  0x39   : > { %590 = vmatpush3.msra.mxu0 %v296_v47  ;;  %678 = vmatpush3.msra.mxu1 %v296_v47  ;;  %v278_v16 = vld [vmem:[%s953_s27 + $0xb0] sm:$0xff]  ;;  %v281_v17 = vld [vmem:[%s953_s27 + $0xc8] sm:$0xff]  ;;  %v264_v18 = vld [vmem:[%s953_s27 + $0x40] sm:$0xff] }
  0x3a   : > { %591 = vmatprep.subr.mxu0 %v311_v48  ;;  %663 = vmatprep.subr.mxu1 %v311_v48  ;;  %v267_v19 = vld [vmem:[%s953_s27 + $0x58] sm:$0xff]  ;;  %v280_v20 = vld [vmem:[%s953_s27 + $0xc0] sm:$0xff]  ;;  %v266_v22 = vld [vmem:[%s953_s27 + $0x50] sm:$0xff] }
  0x3b   : > { %592 = vmatpush3.msra.mxu0 %v295_v49  ;;  %679 = vmatpush3.msra.mxu1 %v295_v49  ;;  %v283_v21 = vld [vmem:[%s953_s27 + $0xd8] sm:$0xff]  ;;  %v269_v23 = vld [vmem:[%s953_s27 + $0x68] sm:$0xff]  ;;  %v282_v24 = vld [vmem:[%s953_s27 + $0xd0] sm:$0xff] }
  0x3c   : > { %593 = vmatprep.subr.mxu0 %v310_v50  ;;  %664 = vmatprep.subr.mxu1 %v310_v50  ;;  %v285_v25 = vld [vmem:[%s953_s27 + $0xe8] sm:$0xff]  ;;  %v268_v26 = vld [vmem:[%s953_s27 + $0x60] sm:$0xff]  ;;  %v271_v27 = vld [vmem:[%s953_s27 + $0x78] sm:$0xff] }
  0x3d   : > { %594 = vmatpush3.msra.mxu0 %v294_v51  ;;  %680 = vmatpush3.msra.mxu1 %v294_v51  ;;  %v284_v28 = vld [vmem:[%s953_s27 + $0xe0] sm:$0xff]  ;;  %v287_v29 = vld [vmem:[%s953_s27 + $0xf8] sm:$0xff]  ;;  %v270_v30 = vld [vmem:[%s953_s27 + $0x70] sm:$0xff] }
  0x3e   : > { %595 = vmatprep.subr.mxu0 %v309_v52  ;;  %665 = vmatprep.subr.mxu1 %v309_v52  ;;  %v286_v31 = vld [vmem:[%s953_s27 + $0xf0] sm:$0xff] }
  0x3f   : > { %596 = vmatpush3.msra.mxu0 %v293_v53  ;;  %681 = vmatpush3.msra.mxu1 %v293_v53 }
  0x40   : > { %597 = vmatprep.subr.mxu0 %v308_v54  ;;  %666 = vmatprep.subr.mxu1 %v308_v54 }
  0x41   : > { %598 = vmatpush3.msra.mxu0 %v292_v55  ;;  %682 = vmatpush3.msra.mxu1 %v292_v55 }
  0x42   : > { %599 = vmatprep.subr.mxu0 %v307_v56  ;;  %667 = vmatprep.subr.mxu1 %v307_v56 }
  0x43   : > { %600 = vmatpush3.msra.mxu0 %v291_v57  ;;  %683 = vmatpush3.msra.mxu1 %v291_v57 }
  0x44   : > { %601 = vmatprep.subr.mxu0 %v306_v58  ;;  %668 = vmatprep.subr.mxu1 %v306_v58 }
  0x45   : > { %602 = vmatpush3.msra.mxu0 %v290_v59  ;;  %684 = vmatpush3.msra.mxu1 %v290_v59 }
  0x46   : > { %603 = vmatprep.subr.mxu0 %v305_v60  ;;  %669 = vmatprep.subr.mxu1 %v305_v60 }
  0x47   : > { %604 = vmatpush3.msra.mxu0 %v289_v61  ;;  %685 = vmatpush3.msra.mxu1 %v289_v61 }
  0x48   : > { %605 = vmatprep.subr.mxu0 %v304_v62  ;;  %384 = vmatprep.mubr.f32.mxu0 %v257_v63  ;;  %v570_v63 = vld [vmem:[%s1010_s2] ss:$0 sm:$0xff] }
  0x49   : > { %606 = vmatpush3.msra.mxu0 %v288_v0  ;;  %670 = vmatprep.subr.mxu1 %v304_v62 }
  0x4a   : > { %385 = vmatmul.mubr.f32.vlgmr.msra.gmra.mxu0 %v256_v1  ;;  %686 = vmatpush3.msra.mxu1 %v288_v0 }
  0x4b   : > { %424 = vmatprep.mubr.f32.mxu1 %v273_v2  ;;  %389 = vmatprep.mubr.f32.mxu0 %v259_v3 }
  0x4c   : > { %425 = vmatmul.mubr.f32.vlgmr.msra.gmra.mxu1 %v272_v4 }
  0x4d   : > { %429 = vmatprep.mubr.f32.mxu1 %v275_v5 }
  0x4e   : > { %390 = vmatmul.mubr.f32.gmra.mxu0 %v258_v6 }
  0x4f   : > { %394 = vmatprep.mubr.f32.mxu0 %v261_v7 }
  0x50   : > { %430 = vmatmul.mubr.f32.gmra.mxu1 %v274_v8 }
  0x51   : > { %434 = vmatprep.mubr.f32.mxu1 %v277_v9 }
  0x52   : > { %395 = vmatmul.mubr.f32.gmra.mxu0 %v260_v10 }
  0x53   : > { %399 = vmatprep.mubr.f32.mxu0 %v263_v11 }
  0x54   : > { %435 = vmatmul.mubr.f32.gmra.mxu1 %v276_v12 }
  0x55   : > { %439 = vmatprep.mubr.f32.mxu1 %v279_v13 }
  0x56   : > { %400 = vmatmul.mubr.f32.gmra.mxu0 %v262_v14 }
  0x57   : > { %404 = vmatprep.mubr.f32.mxu0 %v265_v15 }
  0x58   : > { %440 = vmatmul.mubr.f32.gmra.mxu1 %v278_v16 }
  0x59   : > { %444 = vmatprep.mubr.f32.mxu1 %v281_v17 }
  0x5a   : > { %405 = vmatmul.mubr.f32.gmra.mxu0 %v264_v18 }
  0x5b   : > { %409 = vmatprep.mubr.f32.mxu0 %v267_v19 }
  0x5c   : > { %445 = vmatmul.mubr.f32.gmra.mxu1 %v280_v20 }
  0x5d   : > { %449 = vmatprep.mubr.f32.mxu1 %v283_v21 }
  0x5e   : > { %410 = vmatmul.mubr.f32.gmra.mxu0 %v266_v22 }
  0x5f   : > { %414 = vmatprep.mubr.f32.mxu0 %v269_v23 }
  0x60   : > { %450 = vmatmul.mubr.f32.gmra.mxu1 %v282_v24 }
  0x61   : > { %454 = vmatprep.mubr.f32.mxu1 %v285_v25 }
  0x62   : > { %415 = vmatmul.mubr.f32.gmra.mxu0 %v268_v26 }
  0x63   : > { %419 = vmatprep.mubr.f32.mxu0 %v271_v27 }
  0x64   : > { %455 = vmatmul.mubr.f32.gmra.mxu1 %v284_v28 }
  0x65   : > { %459 = vmatprep.mubr.f32.mxu1 %v287_v29 }
  0x66   : > { %420 = vmatmul.mubr.f32.gmra.mxu0 %v270_v30 }
  0x68   : > { %460 = vmatmul.mubr.f32.gmra.mxu1 %v286_v31 }
 0x10a   : > { %v607_v32 = vpop.f32.mrf.mxu0 }
 0x10c   : > { %v608_v33 = vpop.f32.mrf.mxu0  ;;  %v631_v34 = vpop.f32.mrf.mxu1 }
 0x10d   : > { %v609_v51 = vadd.f32 %v608_v33, %v607_v32 }
 0x10e   : > { %v610_v35 = vpop.f32.mrf.mxu0  ;;  %v632_v36 = vpop.f32.mrf.mxu1 }
 0x10f   : > { %v633_v55 = vadd.f32 %v632_v36, %v631_v34 }
 0x110   : > { %v611_v37 = vpop.f32.mrf.mxu0  ;;  %v634_v38 = vpop.f32.mrf.mxu1 }
 0x111   : > { %v612_v59 = vadd.f32 %v611_v37, %v610_v35 }
 0x112   : > { %v613_v39 = vpop.f32.mrf.mxu0  ;;  %v635_v40 = vpop.f32.mrf.mxu1 }
 0x113   : > { %v636_v2 = vadd.f32 %v635_v40, %v634_v38 }
 0x114   : > { %v614_v41 = vpop.f32.mrf.mxu0  ;;  %v637_v42 = vpop.f32.mrf.mxu1 }
 0x115   : > { %v615_v5 = vadd.f32 %v614_v41, %v613_v39 }
 0x116   : > { %v616_v43 = vpop.f32.mrf.mxu0  ;;  %v638_v44 = vpop.f32.mrf.mxu1 }
 0x117   : > { %v639_v14 = vadd.f32 %v638_v44, %v637_v42 }
 0x118   : > { %v617_v45 = vpop.f32.mrf.mxu0  ;;  %v640_v46 = vpop.f32.mrf.mxu1 }
 0x119   : > { %v618_v18 = vadd.f32 %v617_v45, %v616_v43 }
 0x11a   : > { %v619_v47 = vpop.f32.mrf.mxu0  ;;  %v641_v48 = vpop.f32.mrf.mxu1 }
 0x11b   : > { %v642_v26 = vadd.f32 %v641_v48, %v640_v46 }
 0x11c   : > { %v620_v49 = vpop.f32.mrf.mxu0  ;;  %v643_v50 = vpop.f32.mrf.mxu1 }
 0x11d   : > { %v621_v52 = vadd.f32 %v620_v49, %v619_v47 }
 0x11e   : > { %v622_v53 = vpop.f32.mrf.mxu0  ;;  %v644_v54 = vpop.f32.mrf.mxu1 }
 0x11f   : > { %v465_v56 = vmax.f32 %v609_v51, %v621_v52  ;;  %v645_v60 = vadd.f32 %v644_v54, %v643_v50 }
 0x120   : > { %v623_v57 = vpop.f32.mrf.mxu0  ;;  %v646_v58 = vpop.f32.mrf.mxu1 }
 0x121   : > { %v466_v61 = vmax.f32 %v465_v56, %v633_v55  ;;  %v624_v62 = vadd.f32 %v623_v57, %v622_v53 }
 0x122   : > { %v625_v0 = vpop.f32.mrf.mxu0  ;;  %v647_v1 = vpop.f32.mrf.mxu1 }
 0x123   : > { %v467_v3 = vmax.f32 %v466_v61, %v645_v60  ;;  %v468_v4 = vmax.f32 %v612_v59, %v624_v62  ;;  %v648_v9 = vadd.f32 %v647_v1, %v646_v58 }
 0x124   : > { %v626_v6 = vpop.f32.mrf.mxu0  ;;  %v649_v7 = vpop.f32.mrf.mxu1 }
 0x125   : > { %v484_v8 = vadd.f32 %v570_v63, %v467_v3  ;;  %v469_v10 = vmax.f32 %v468_v4, %v636_v2  ;;  %v627_v11 = vadd.f32 %v626_v6, %v625_v0 }
 0x126   : > { %v628_v12 = vpop.f32.mrf.mxu0  ;;  %v650_v13 = vpop.f32.mrf.mxu1 }
 0x127   : > { %v488_v15 = vmax.f32 %v484_v8, 0.0  ;;  %v470_v16 = vmax.f32 %v469_v10, %v648_v9  ;;  %v471_v17 = vmax.f32 %v615_v5, %v627_v11  ;;  %v651_v22 = vadd.f32 %v650_v13, %v649_v7 }
 0x128   : > { %v629_v19 = vpop.f32.mrf.mxu0  ;;  %v652_v20 = vpop.f32.mrf.mxu1 }
 0x129   : > { %492 = vst [vmem:[%s254_s7] sm:$0xff] %v488_v15  ;;  %v485_v21 = vadd.f32 %v570_v63, %v470_v16  ;;  %v472_v23 = vmax.f32 %v471_v17, %v639_v14  ;;  %v630_v24 = vadd.f32 %v629_v19, %v628_v12 }
 0x12a   : > { %v653_v25 = vpop.f32.mrf.mxu1 }
 0x12b   : > { %v489_v27 = vmax.f32 %v485_v21, 0.0  ;;  %v473_v28 = vmax.f32 %v472_v23, %v651_v22  ;;  %v474_v29 = vmax.f32 %v618_v18, %v630_v24  ;;  %v654_v31 = vadd.f32 %v653_v25, %v652_v20 }
 0x12d   : > { %493 = vst [vmem:[%s254_s7 + $0x8] sm:$0xff] %v489_v27  ;;  %v486_v30 = vadd.f32 %v570_v63, %v473_v28  ;;  %v475_v32 = vmax.f32 %v474_v29, %v642_v26 }
 0x12f   : > { %v490_v33 = vmax.f32 %v486_v30, 0.0  ;;  %v476_v34 = vmax.f32 %v475_v32, %v654_v31 }
 0x131   : > { %494 = vst [vmem:[%s254_s7 + $0x10] sm:$0xff] %v490_v33  ;;  %v487_v35 = vadd.f32 %v570_v63, %v476_v34 }
 0x133   : > { %v491_v36 = vmax.f32 %v487_v35, 0.0 }
 0x135   : > { %495 = vst [vmem:[%s254_s7 + $0x18] sm:$0xff] %v491_v36 }
 0x136 PF: > { %p10_p9 = scmp.ge.s32.totalorder %s772_s16, 4   ;;  %s1012_s12 = smov %s729_s13 }
 0x137   : > { %s1013_s13 = smov %s781_s19  ;;  %s1014_s14 = smov %s772_s16 }
 0x138   :  { %12 = sbr.rel (!%p10_p9) target bundleno = 2 (0x2), region = 90 }

// kernel: net_forward.5
= control target key start
LH: loop header
LB: loop body
LE: loop exit
PB: predicated region body
PF: predicated region fallthrough
CT: control target
= control target key end

     0   :  { %vm614_vm0 = vmmov 0   ;;  %s1001_s1 = inlined_call_operand.vmem [shape: f32[512,128], index: 1, kind: input, shape index: {}]   ;;  %s1002_s0 = inlined_call_operand.vmem [shape: f32[8,512], index: 0, kind: input, shape index: {}]   ;;  %s1003_s3 = inlined_call_operand.vmem [shape: f32[128,128], index: 3, kind: input, shape index: {}]   ;;  %s1004_s5 = inlined_call_operand.vmem [shape: f32[128,128], index: 5, kind: input, shape index: {}]   ;;  %s1005_s2 = inlined_call_operand.vmem [shape: f32[1,128], index: 2, kind: input, shape index: {}]   ;;  %s1006_s4 = inlined_call_operand.vmem [shape: f32[1,128], index: 4, kind: input, shape index: {}]   ;;  %s1007_s6 = inlined_call_operand.vmem [shape: f32[1,128], index: 6, kind: input, shape index: {}]   ;;  %s1008_s7 = inlined_call_operand.vmem [shape: f32[8,128], index: 7, kind: output, shape index: {}]  }
   0x1   :  { %v61_v0 = vld [vmem:[%s1001_s1 + $0xf8] sm:$0xff]  ;;  %v60_v4 = vld [vmem:[%s1001_s1 + $0xf0] sm:$0xff]  ;;  %v59_v8 = vld [vmem:[%s1001_s1 + $0xe8] sm:$0xff] }
   0x2   :  { %v93_v1 = vld [vmem:[%s1001_s1 + $0x1f8] sm:$0xff]  ;;  %437 = vmatprep.subr.mxu0 %v61_v0  ;;  %v92_v5 = vld [vmem:[%s1001_s1 + $0x1f0] sm:$0xff]  ;;  %v91_v9 = vld [vmem:[%s1001_s1 + $0x1e8] sm:$0xff] }
   0x3   :  { %v45_v2 = vld [vmem:[%s1001_s1 + $0x78] sm:$0xff]  ;;  %472 = vmatprep.subr.mxu1 %v93_v1  ;;  %v44_v6 = vld [vmem:[%s1001_s1 + $0x70] sm:$0xff]  ;;  %v43_v10 = vld [vmem:[%s1001_s1 + $0x68] sm:$0xff] }
   0x4   :  { %v77_v3 = vld [vmem:[%s1001_s1 + $0x178] sm:$0xff]  ;;  %438 = vmatpush3.msra.mxu0 %v45_v2  ;;  %v76_v7 = vld [vmem:[%s1001_s1 + $0x170] sm:$0xff]  ;;  %v75_v11 = vld [vmem:[%s1001_s1 + $0x168] sm:$0xff] }
   0x5   :  { %473 = vmatpush3.msra.mxu1 %v77_v3  ;;  %439 = vmatprep.subr.mxu0 %v60_v4  ;;  %v58_v12 = vld [vmem:[%s1001_s1 + $0xe0] sm:$0xff]  ;;  %v57_v16 = vld [vmem:[%s1001_s1 + $0xd8] sm:$0xff]  ;;  %v56_v20 = vld [vmem:[%s1001_s1 + $0xd0] sm:$0xff] }
   0x6   :  { %474 = vmatprep.subr.mxu1 %v92_v5  ;;  %440 = vmatpush3.msra.mxu0 %v44_v6  ;;  %v90_v13 = vld [vmem:[%s1001_s1 + $0x1e0] sm:$0xff]  ;;  %v89_v17 = vld [vmem:[%s1001_s1 + $0x1d8] sm:$0xff]  ;;  %v88_v21 = vld [vmem:[%s1001_s1 + $0x1d0] sm:$0xff]  ;;  %v613_v5 = vmov 0.0  }
   0x7   :  { %475 = vmatpush3.msra.mxu1 %v76_v7  ;;  %441 = vmatprep.subr.mxu0 %v59_v8  ;;  %v42_v14 = vld [vmem:[%s1001_s1 + $0x60] sm:$0xff]  ;;  %v41_v18 = vld [vmem:[%s1001_s1 + $0x58] sm:$0xff]  ;;  %v40_v22 = vld [vmem:[%s1001_s1 + $0x50] sm:$0xff] }
   0x8   :  { %476 = vmatprep.subr.mxu1 %v91_v9  ;;  %v74_v15 = vld [vmem:[%s1001_s1 + $0x160] sm:$0xff]  ;;  %442 = vmatpush3.msra.mxu0 %v43_v10  ;;  %v73_v19 = vld [vmem:[%s1001_s1 + $0x158] sm:$0xff]  ;;  %v72_v23 = vld [vmem:[%s1001_s1 + $0x150] sm:$0xff] }
   0x9   :  { %477 = vmatpush3.msra.mxu1 %v75_v11  ;;  %443 = vmatprep.subr.mxu0 %v58_v12  ;;  %v55_v24 = vld [vmem:[%s1001_s1 + $0xc8] sm:$0xff]  ;;  %v54_v28 = vld [vmem:[%s1001_s1 + $0xc0] sm:$0xff]  ;;  %v53_v32 = vld [vmem:[%s1001_s1 + $0xb8] sm:$0xff] }
   0xa   :  { %478 = vmatprep.subr.mxu1 %v90_v13  ;;  %444 = vmatpush3.msra.mxu0 %v42_v14  ;;  %v87_v25 = vld [vmem:[%s1001_s1 + $0x1c8] sm:$0xff]  ;;  %v86_v29 = vld [vmem:[%s1001_s1 + $0x1c0] sm:$0xff]  ;;  %v85_v33 = vld [vmem:[%s1001_s1 + $0x1b8] sm:$0xff] }
   0xb   :  { %479 = vmatpush3.msra.mxu1 %v74_v15  ;;  %445 = vmatprep.subr.mxu0 %v57_v16  ;;  %v39_v26 = vld [vmem:[%s1001_s1 + $0x48] sm:$0xff]  ;;  %v38_v30 = vld [vmem:[%s1001_s1 + $0x40] sm:$0xff]  ;;  %v37_v34 = vld [vmem:[%s1001_s1 + $0x38] sm:$0xff] }
   0xc   :  { %480 = vmatprep.subr.mxu1 %v89_v17  ;;  %446 = vmatpush3.msra.mxu0 %v41_v18  ;;  %v71_v27 = vld [vmem:[%s1001_s1 + $0x148] sm:$0xff]  ;;  %v70_v31 = vld [vmem:[%s1001_s1 + $0x140] sm:$0xff]  ;;  %v69_v35 = vld [vmem:[%s1001_s1 + $0x138] sm:$0xff] }
   0xd   :  { %481 = vmatpush3.msra.mxu1 %v73_v19  ;;  %447 = vmatprep.subr.mxu0 %v56_v20  ;;  %v52_v36 = vld [vmem:[%s1001_s1 + $0xb0] sm:$0xff]  ;;  %v51_v40 = vld [vmem:[%s1001_s1 + $0xa8] sm:$0xff]  ;;  %v50_v44 = vld [vmem:[%s1001_s1 + $0xa0] sm:$0xff] }
   0xe   :  { %482 = vmatprep.subr.mxu1 %v88_v21  ;;  %448 = vmatpush3.msra.mxu0 %v40_v22  ;;  %v84_v37 = vld [vmem:[%s1001_s1 + $0x1b0] sm:$0xff]  ;;  %v83_v41 = vld [vmem:[%s1001_s1 + $0x1a8] sm:$0xff]  ;;  %v82_v45 = vld [vmem:[%s1001_s1 + $0x1a0] sm:$0xff] }
   0xf   :  { %483 = vmatpush3.msra.mxu1 %v72_v23  ;;  %449 = vmatprep.subr.mxu0 %v55_v24  ;;  %v36_v38 = vld [vmem:[%s1001_s1 + $0x30] sm:$0xff]  ;;  %v35_v42 = vld [vmem:[%s1001_s1 + $0x28] sm:$0xff]  ;;  %v34_v46 = vld [vmem:[%s1001_s1 + $0x20] sm:$0xff] }
  0x10   :  { %484 = vmatprep.subr.mxu1 %v87_v25  ;;  %450 = vmatpush3.msra.mxu0 %v39_v26  ;;  %v68_v39 = vld [vmem:[%s1001_s1 + $0x130] sm:$0xff]  ;;  %v67_v43 = vld [vmem:[%s1001_s1 + $0x128] sm:$0xff]  ;;  %v66_v47 = vld [vmem:[%s1001_s1 + $0x120] sm:$0xff] }
  0x11   :  { %485 = vmatpush3.msra.mxu1 %v71_v27  ;;  %451 = vmatprep.subr.mxu0 %v54_v28  ;;  %v49_v48 = vld [vmem:[%s1001_s1 + $0x98] sm:$0xff]  ;;  %v48_v52 = vld [vmem:[%s1001_s1 + $0x90] sm:$0xff]  ;;  %v47_v56 = vld [vmem:[%s1001_s1 + $0x88] sm:$0xff] }
  0x12   :  { %486 = vmatprep.subr.mxu1 %v86_v29  ;;  %452 = vmatpush3.msra.mxu0 %v38_v30  ;;  %v81_v49 = vld [vmem:[%s1001_s1 + $0x198] sm:$0xff]  ;;  %v80_v53 = vld [vmem:[%s1001_s1 + $0x190] sm:$0xff]  ;;  %v79_v57 = vld [vmem:[%s1001_s1 + $0x188] sm:$0xff] }
  0x13   :  { %487 = vmatpush3.msra.mxu1 %v70_v31  ;;  %453 = vmatprep.subr.mxu0 %v53_v32  ;;  %v33_v50 = vld [vmem:[%s1001_s1 + $0x18] sm:$0xff]  ;;  %v32_v54 = vld [vmem:[%s1001_s1 + $0x10] sm:$0xff]  ;;  %v31_v58 = vld [vmem:[%s1001_s1 + $0x8] sm:$0xff] }
  0x14   :  { %488 = vmatprep.subr.mxu1 %v85_v33  ;;  %454 = vmatpush3.msra.mxu0 %v37_v34  ;;  %v65_v51 = vld [vmem:[%s1001_s1 + $0x118] sm:$0xff]  ;;  %v64_v55 = vld [vmem:[%s1001_s1 + $0x110] sm:$0xff]  ;;  %v63_v59 = vld [vmem:[%s1001_s1 + $0x108] sm:$0xff] }
  0x15   :  { %489 = vmatpush3.msra.mxu1 %v69_v35  ;;  %455 = vmatprep.subr.mxu0 %v52_v36  ;;  %v46_v60 = vld [vmem:[%s1001_s1 + $0x80] sm:$0xff]  ;;  %v27_v63 = vld [vmem:[%s1002_s0 + $0x8] sm:$0xff]  ;;  %v29_v1 = vld [vmem:[%s1002_s0 + $0x18] sm:$0xff] }
  0x16   :  { %490 = vmatprep.subr.mxu1 %v84_v37  ;;  %456 = vmatpush3.msra.mxu0 %v36_v38  ;;  %v78_v61 = vld [vmem:[%s1001_s1 + $0x180] sm:$0xff]  ;;  %v28_v3 = vld [vmem:[%s1002_s0 + $0x10] sm:$0xff]  ;;  %v257_v4 = vld [vmem:[%s1003_s3 + $0x78] sm:$0xff] }
  0x17   :  { %491 = vmatpush3.msra.mxu1 %v68_v39  ;;  %457 = vmatprep.subr.mxu0 %v51_v40  ;;  %v30_v62 = vld [vmem:[%s1001_s1] sm:$0xff]  ;;  %v256_v6 = vld [vmem:[%s1003_s3 + $0x70] sm:$0xff]  ;;  %v255_v7 = vld [vmem:[%s1003_s3 + $0x68] sm:$0xff] }
  0x18   :  { %492 = vmatprep.subr.mxu1 %v83_v41  ;;  %458 = vmatpush3.msra.mxu0 %v35_v42  ;;  %v62_v0 = vld [vmem:[%s1001_s1 + $0x100] sm:$0xff]  ;;  %v253_v9 = vld [vmem:[%s1003_s3 + $0x58] sm:$0xff]  ;;  %v252_v10 = vld [vmem:[%s1003_s3 + $0x50] sm:$0xff] }
  0x19   :  { %493 = vmatpush3.msra.mxu1 %v67_v43  ;;  %459 = vmatprep.subr.mxu0 %v50_v44  ;;  %v26_v2 = vld [vmem:[%s1002_s0] sm:$0xff]  ;;  %v251_v11 = vld [vmem:[%s1003_s3 + $0x48] sm:$0xff]  ;;  %v249_v13 = vld [vmem:[%s1003_s3 + $0x38] sm:$0xff] }
  0x1a   :  { %494 = vmatprep.subr.mxu1 %v82_v45  ;;  %460 = vmatpush3.msra.mxu0 %v34_v46  ;;  %v254_v8 = vld [vmem:[%s1003_s3 + $0x60] sm:$0xff]  ;;  %v248_v14 = vld [vmem:[%s1003_s3 + $0x30] sm:$0xff]  ;;  %v247_v15 = vld [vmem:[%s1003_s3 + $0x28] sm:$0xff] }
  0x1b   :  { %495 = vmatpush3.msra.mxu1 %v66_v47  ;;  %461 = vmatprep.subr.mxu0 %v49_v48  ;;  %v250_v12 = vld [vmem:[%s1003_s3 + $0x40] sm:$0xff]  ;;  %v245_v17 = vld [vmem:[%s1003_s3 + $0x18] sm:$0xff]  ;;  %v244_v18 = vld [vmem:[%s1003_s3 + $0x10] sm:$0xff] }
  0x1c   :  { %496 = vmatprep.subr.mxu1 %v81_v49  ;;  %462 = vmatpush3.msra.mxu0 %v33_v50  ;;  %v246_v16 = vld [vmem:[%s1003_s3 + $0x20] sm:$0xff]  ;;  %v243_v19 = vld [vmem:[%s1003_s3 + $0x8] sm:$0xff]  ;;  %v351_v21 = vld [vmem:[%s1004_s5 + $0x78] sm:$0xff] }
  0x1d   :  { %497 = vmatpush3.msra.mxu1 %v65_v51  ;;  %463 = vmatprep.subr.mxu0 %v48_v52  ;;  %v242_v20 = vld [vmem:[%s1003_s3] sm:$0xff]  ;;  %v350_v22 = vld [vmem:[%s1004_s5 + $0x70] sm:$0xff]  ;;  %v349_v23 = vld [vmem:[%s1004_s5 + $0x68] sm:$0xff] }
  0x1e   :  { %498 = vmatprep.subr.mxu1 %v80_v53  ;;  %464 = vmatpush3.msra.mxu0 %v32_v54  ;;  %v348_v24 = vld [vmem:[%s1004_s5 + $0x60] sm:$0xff]  ;;  %v347_v25 = vld [vmem:[%s1004_s5 + $0x58] sm:$0xff]  ;;  %v346_v26 = vld [vmem:[%s1004_s5 + $0x50] sm:$0xff] }
  0x1f   :  { %499 = vmatpush3.msra.mxu1 %v64_v55  ;;  %465 = vmatprep.subr.mxu0 %v47_v56  ;;  %v345_v27 = vld [vmem:[%s1004_s5 + $0x48] sm:$0xff]  ;;  %v344_v28 = vld [vmem:[%s1004_s5 + $0x40] sm:$0xff]  ;;  %v343_v29 = vld [vmem:[%s1004_s5 + $0x38] sm:$0xff] }
  0x20   :  { %500 = vmatprep.subr.mxu1 %v79_v57  ;;  %466 = vmatpush3.msra.mxu0 %v31_v58  ;;  %v342_v30 = vld [vmem:[%s1004_s5 + $0x30] sm:$0xff]  ;;  %v341_v31 = vld [vmem:[%s1004_s5 + $0x28] sm:$0xff]  ;;  %v340_v32 = vld [vmem:[%s1004_s5 + $0x20] sm:$0xff] }
  0x21   :  { %501 = vmatpush3.msra.mxu1 %v63_v59  ;;  %467 = vmatprep.subr.mxu0 %v46_v60  ;;  %v339_v33 = vld [vmem:[%s1004_s5 + $0x18] sm:$0xff]  ;;  %v434_v36 = vld [vmem:[%s1005_s2] ss:$0 sm:$0xff]  ;;  %v338_v44 = vld [vmem:[%s1004_s5 + $0x10] sm:$0xff] }
  0x22   :  { %502 = vmatprep.subr.mxu1 %v78_v61  ;;  %468 = vmatpush3.msra.mxu0 %v30_v62  ;;  %v337_v45 = vld [vmem:[%s1004_s5 + $0x8] sm:$0xff]  ;;  %v336_v46 = vld [vmem:[%s1004_s5] sm:$0xff] }
  0x23   :  { %165 = vmatprep.mubr.f32.mxu0 %v27_v63  ;;  %503 = vmatpush3.msra.mxu1 %v62_v0  ;;  %v435_v47 = vld [vmem:[%s1006_s4] ss:$0 sm:$0xff] }
  0x24   :  { %235 = vmatprep.mubr.f32.mxu1 %v29_v1  ;;  %166 = vmatmul.mubr.f32.vlgmr.msra.gmra.mxu0 %v26_v2  ;;  %v436_v52 = vld [vmem:[%s1007_s6] ss:$0 sm:$0xff] }
  0x25   :  { %236 = vmatmul.mubr.f32.vlgmr.msra.gmra.mxu1 %v28_v3  ;;  %541 = vmatprep.subr.mxu0 %v613_v5 }
  0x26   :  { %576 = vmatprep.subr.mxu1 %v613_v5  ;;  %542 = vmatpush3.msra.mxu0 %v257_v4 }
  0x27   :  { %543 = vmatprep.subr.mxu0 %v613_v5  ;;  %573 = vmatprep.mubr.msk.f32.mxu0 %vm614_vm0, %v613_v5 }
  0x28   :  { %544 = vmatpush3.msra.mxu0 %v256_v6  ;;  %608 = vmatprep.mubr.msk.f32.mxu1 %vm614_vm0, %v613_v5 }
  0x29   :  { %545 = vmatprep.subr.mxu0 %v613_v5  ;;  %577 = vmatpush3.msra.mxu1 %v351_v21 }
  0x2a   :  { %546 = vmatpush3.msra.mxu0 %v255_v7  ;;  %578 = vmatprep.subr.mxu1 %v613_v5 }
  0x2b   :  { %547 = vmatprep.subr.mxu0 %v613_v5  ;;  %579 = vmatpush3.msra.mxu1 %v350_v22 }
  0x2c   :  { %548 = vmatpush3.msra.mxu0 %v254_v8  ;;  %580 = vmatprep.subr.mxu1 %v613_v5 }
  0x2d   :  { %549 = vmatprep.subr.mxu0 %v613_v5  ;;  %581 = vmatpush3.msra.mxu1 %v349_v23 }
  0x2e   :  { %550 = vmatpush3.msra.mxu0 %v253_v9  ;;  %582 = vmatprep.subr.mxu1 %v613_v5 }
  0x2f   :  { %551 = vmatprep.subr.mxu0 %v613_v5  ;;  %583 = vmatpush3.msra.mxu1 %v348_v24 }
  0x30   :  { %552 = vmatpush3.msra.mxu0 %v252_v10  ;;  %584 = vmatprep.subr.mxu1 %v613_v5 }
  0x31   :  { %553 = vmatprep.subr.mxu0 %v613_v5  ;;  %585 = vmatpush3.msra.mxu1 %v347_v25 }
  0x32   :  { %554 = vmatpush3.msra.mxu0 %v251_v11  ;;  %586 = vmatprep.subr.mxu1 %v613_v5 }
  0x33   :  { %555 = vmatprep.subr.mxu0 %v613_v5  ;;  %587 = vmatpush3.msra.mxu1 %v346_v26 }
  0x34   :  { %556 = vmatpush3.msra.mxu0 %v250_v12  ;;  %588 = vmatprep.subr.mxu1 %v613_v5 }
  0x35   :  { %557 = vmatprep.subr.mxu0 %v613_v5  ;;  %589 = vmatpush3.msra.mxu1 %v345_v27 }
  0x36   :  { %558 = vmatpush3.msra.mxu0 %v249_v13  ;;  %590 = vmatprep.subr.mxu1 %v613_v5 }
  0x37   :  { %559 = vmatprep.subr.mxu0 %v613_v5  ;;  %591 = vmatpush3.msra.mxu1 %v344_v28 }
  0x38   :  { %560 = vmatpush3.msra.mxu0 %v248_v14  ;;  %592 = vmatprep.subr.mxu1 %v613_v5 }
  0x39   :  { %561 = vmatprep.subr.mxu0 %v613_v5  ;;  %593 = vmatpush3.msra.mxu1 %v343_v29 }
  0x3a   :  { %562 = vmatpush3.msra.mxu0 %v247_v15  ;;  %594 = vmatprep.subr.mxu1 %v613_v5 }
  0x3b   :  { %563 = vmatprep.subr.mxu0 %v613_v5  ;;  %595 = vmatpush3.msra.mxu1 %v342_v30 }
  0x3c   :  { %564 = vmatpush3.msra.mxu0 %v246_v16  ;;  %596 = vmatprep.subr.mxu1 %v613_v5 }
  0x3d   :  { %565 = vmatprep.subr.mxu0 %v613_v5  ;;  %597 = vmatpush3.msra.mxu1 %v341_v31 }
  0x3e   :  { %566 = vmatpush3.msra.mxu0 %v245_v17  ;;  %598 = vmatprep.subr.mxu1 %v613_v5 }
  0x3f   :  { %567 = vmatprep.subr.mxu0 %v613_v5  ;;  %599 = vmatpush3.msra.mxu1 %v340_v32 }
  0x40   :  { %568 = vmatpush3.msra.mxu0 %v244_v18  ;;  %600 = vmatprep.subr.mxu1 %v613_v5 }
  0x41   :  { %569 = vmatprep.subr.mxu0 %v613_v5  ;;  %601 = vmatpush3.msra.mxu1 %v339_v33 }
  0x42   :  { %570 = vmatpush3.msra.mxu0 %v243_v19  ;;  %602 = vmatprep.subr.mxu1 %v613_v5 }
  0x43   :  { %571 = vmatprep.subr.mxu0 %v613_v5  ;;  %603 = vmatpush3.msra.mxu1 %v338_v44 }
  0x44   :  { %572 = vmatpush3.msra.mxu0 %v242_v20  ;;  %604 = vmatprep.subr.mxu1 %v613_v5 }
  0x45   :  { %605 = vmatpush3.msra.mxu1 %v337_v45 }
  0x46   :  { %606 = vmatprep.subr.mxu1 %v613_v5 }
  0x47   :  { %607 = vmatpush3.msra.mxu1 %v336_v46 }
  0xe4   :  { %v469_v34 = vpop.f32.mrf.mxu0 }
  0xe5   :  { %v504_v35 = vpop.f32.mrf.mxu1 }
  0xe6   :  { %v470_v37 = vpop.f32.mrf.mxu0 }
  0xe7   :  { %v505_v38 = vpop.f32.mrf.mxu1  ;;  %v471_v39 = vadd.f32 %v470_v37, %v469_v34 }
  0xe8   :  { %v506_v41 = vadd.f32 %v505_v38, %v504_v35 }
  0xe9   :  { %v168_v40 = vadd.f32 %v471_v39, %v434_v36 }
  0xeb   :  { %v238_v42 = vadd.f32 %v506_v41, %v168_v40 }
  0xed   :  { %v241_v43 = vmax.f32 %v238_v42, 0.0 }
  0xef   :  { %574 = vmatmul.mubr.f32.vlgmr.msra.gmra.mxu0 %v241_v43 }
 0x1af   :  { %v331_v48 = vpop.f32.mrf.mxu0 }
 0x1b0   :  { %v332_v49 = vadd.f32 %v435_v47, %v331_v48 }
 0x1b1   :  { %v575_v50 = vpop.f32.mrf.mxu0 }
 0x1b2   :  { %v335_v51 = vmax.f32 %v332_v49, 0.0 }
 0x1b4   :  { %609 = vmatmul.mubr.f32.vlgmr.msra.gmra.mxu1 %v335_v51 }
 0x274   :  { %v425_v53 = vpop.f32.mrf.mxu1 }
 0x275   :  { %v426_v54 = vadd.f32 %v436_v52, %v425_v53 }
 0x276   :  { %v610_v55 = vpop.f32.mrf.mxu1 }
 0x277   :  { %429 = vst [vmem:[%s1008_s7] sm:$0xff] %v426_v54 }

</bundles_post_ra>
